<compile_context>
chip_gen: v5e
topology: v5e:2x2
jax: 0.10.0
libtpu: 0.0.40
codegen_flags: <defaults>
</compile_context>

<pallas_src>
import numpy as np

import jax
import jax.numpy as jnp
from jax import lax
from jax.experimental import pallas as pl
from jax.experimental.pallas import tpu as pltpu


def _cbam_kernel(x_ref, w1t_ref, w2t_ref, k_ref, cb_ref, o_ref):
    """One batch element per grid step.

    x_ref  : (1, C, HW)  VMEM  input feature map (NCHW with spatial flattened)
    w1t_ref: (C, Cr)     VMEM  shared-MLP 1x1 conv #1 weight, transposed
    w2t_ref: (C, Cr)     VMEM  shared-MLP 1x1 conv #2 weight, transposed
    k_ref  : (2, HW, HW) VMEM  7x7/pad-3 conv as dense matrices (0:mean, 1:max)
    cb_ref : (1,)        SMEM  7x7 conv bias
    o_ref  : (1, C, HW)  VMEM  output
    """
    f32 = jnp.float32
    C = x_ref.shape[1]
    HW = x_ref.shape[2]

    # ---- channel attention: global pools are single lane reductions --------
    xs = x_ref[0].astype(f32)                                    # (C, HW)
    avg_col = jnp.sum(xs, axis=1, keepdims=True) * (1.0 / HW)    # (C, 1)
    max_col = jnp.max(xs, axis=1, keepdims=True)                 # (C, 1)

    # Tiny shared MLP, kept in the C-on-sublanes orientation (pure VPU plus a
    # 3-stage sublane reduce / 8-lane reduce; cheaper than an MXU round trip).
    # The second 1x1 conv is linear and bias-free, so MLP(avg)+MLP(max) folds
    # into a single second-layer pass over relu(h_avg)+relu(h_max).
    h_avg = jnp.sum(w1t_ref[...] * avg_col, axis=0, keepdims=True)   # (1, Cr)
    h_max = jnp.sum(w1t_ref[...] * max_col, axis=0, keepdims=True)   # (1, Cr)
    h = jnp.maximum(h_avg, 0.0) + jnp.maximum(h_max, 0.0)            # (1, Cr)
    ca_col = jax.nn.sigmoid(
        jnp.sum(w2t_ref[...] * h, axis=1, keepdims=True))            # (C, 1)

    # ---- spatial-attention stats: channel mean/max of (ca * x) -------------
    # xc is consumed immediately by the two sublane-direction reductions and
    # is dead before the conv; nothing full-size stays live across it.
    xc = x_ref[0].astype(f32) * ca_col                           # (C, HW)
    mean_row = jnp.sum(xc, axis=0, keepdims=True) * (1.0 / C)    # (1, HW)
    max_row = jnp.max(xc, axis=0, keepdims=True)                 # (1, HW)

    # ---- 7x7 spatial conv as two small MXU matmuls --------------------------
    logits = (jnp.dot(mean_row, k_ref[0], preferred_element_type=f32)
              + jnp.dot(max_row, k_ref[1], preferred_element_type=f32)
              + cb_ref[0])                                       # (1, HW)
    sa_row = jax.nn.sigmoid(logits)                              # (1, HW)

    # ---- fused epilogue: out = x * ca * sa, one lane-dense store ------------
    # Re-reads the VMEM-resident input instead of keeping xc live (spill fix).
    o_ref[0] = (x_ref[0].astype(f32) * ca_col * sa_row).astype(o_ref.dtype)


def _spatial_conv_matrices(conv_w, H, W):
    """Dense (HW, HW) matrices equivalent to the 7x7 / pad=3 / stride=1 conv,
    one per input channel (0: mean map, 1: max map).  Built once per model."""
    HW = H * W
    pi, po, tap = [], [], []
    for ki in range(7):
        for kj in range(7):
            for ho in range(H):
                hi = ho + ki - 3
                if not 0 <= hi < H:
                    continue
                for wo in range(W):
                    wi = wo + kj - 3
                    if not 0 <= wi < W:
                        continue
                    pi.append(hi * W + wi)
                    po.append(ho * W + wo)
                    tap.append(ki * 7 + kj)
    pi = np.asarray(pi, np.int32)
    po = np.asarray(po, np.int32)
    tap = np.asarray(tap, np.int32)
    kmat = jnp.zeros((2, HW, HW), jnp.float32)
    vals = conv_w.reshape(2, 49).astype(jnp.float32)[:, tap]     # (2, N)
    return kmat.at[:, pi, po].set(vals)


def cbam_pallas(x, w1, w2, conv_w, conv_b):
    """x: (B, C, H, W) NCHW (as in the PyTorch model).  Returns (B, C, H, W)."""
    B, C, H, W = x.shape
    Cr = w1.shape[0]
    HW = H * W
    assert w1.shape == (Cr, C) and w2.shape == (Cr, C)
    assert conv_w.shape == (2, 7, 7) and conv_b.shape == (1,)
    assert C % 8 == 0, "channel axis sits on sublanes; keep it a multiple of 8"
    # TODO(synk): for much larger H*W the whole-image-per-batch block and the
    #             (HW, HW) conv matrices should switch to an H-tiled grid with
    #             a +/-3-row halo (global pool as a first sweep).

    x2 = x.reshape(B, C, HW)                         # free: NCHW is contiguous
    w1t = jnp.asarray(w1, jnp.float32).T             # (C, Cr)
    w2t = jnp.asarray(w2, jnp.float32).T             # (C, Cr)
    kmat = _spatial_conv_matrices(conv_w, H, W)      # (2, HW, HW)

    # VMEM budget from actual block bytes (review item): in/out double-buffered
    # + conv matrices + generous headroom for transient values.
    blk = C * HW * jnp.dtype(x.dtype).itemsize
    vmem_limit = int(min(64 * 2**20, 4 * blk + 2 * kmat.size * 4 + 8 * 2**20))

    out = pl.pallas_call(
        _cbam_kernel,
        out_shape=jax.ShapeDtypeStruct((B, C, HW), x.dtype),
        grid=(B,),
        in_specs=[
            pl.BlockSpec((1, C, HW), lambda b: (b, 0, 0)),
            pl.BlockSpec((C, Cr), lambda b: (0, 0)),
            pl.BlockSpec((C, Cr), lambda b: (0, 0)),
            pl.BlockSpec((2, HW, HW), lambda b: (0, 0, 0)),
            pl.BlockSpec(memory_space=pltpu.MemorySpace.SMEM),
        ],
        out_specs=pl.BlockSpec((1, C, HW), lambda b: (b, 0, 0)),
        compiler_params=pltpu.CompilerParams(
            dimension_semantics=("parallel",),
            vmem_limit_bytes=vmem_limit,
        ),
    )(x2, w1t, w2t, kmat, conv_b.astype(jnp.float32))
    return out.reshape(B, C, H, W)


def cbam_reference(x, w1, w2, conv_w, conv_b):
    """Pure-JAX NCHW reference, mirrors the PyTorch CBAM module exactly."""
    with jax.default_matmul_precision("highest"):
        avg = jnp.mean(x, axis=(2, 3))                           # (B, C)
        mx = jnp.max(x, axis=(2, 3))                             # (B, C)

        def mlp(v):
            return jnp.maximum(v @ w1.T, 0.0) @ w2               # (B, C)

        ca = jax.nn.sigmoid(mlp(avg) + mlp(mx))                  # (B, C)
        out1 = x * ca[:, :, None, None]

        mean_map = jnp.mean(out1, axis=1, keepdims=True)         # (B, 1, H, W)
        max_map = jnp.max(out1, axis=1, keepdims=True)
        stacked = jnp.concatenate([mean_map, max_map], axis=1)   # (B, 2, H, W)
        sa = lax.conv_general_dilated(
            stacked, conv_w[None].astype(x.dtype), (1, 1), ((3, 3), (3, 3)),
            dimension_numbers=("NCHW", "OIHW", "NCHW"),
            precision=lax.Precision.HIGHEST) + conv_b[0]
        sa = jax.nn.sigmoid(sa)                                  # (B, 1, H, W)
        return out1 * sa


if __name__ == "__main__":
    # CBAM(channel=128) as used by ResNetUNet.cbam2 (ratio=16 -> Cr=8), NCHW.
    B, C, H, W = 2, 128, 16, 16
    Cr = C // 16

    key = jax.random.PRNGKey(0)
    kx, k1, k2, k3, k4 = jax.random.split(key, 5)

    x = jax.random.normal(kx, (B, C, H, W), dtype=jnp.float32)
    # shared MLP: Conv2d(C, Cr, 1, bias=False) and Conv2d(Cr, C, 1, bias=False)
    w1 = 0.1 * jax.random.normal(k1, (Cr, C), dtype=jnp.float32)
    w2 = 0.1 * jax.random.normal(k2, (Cr, C), dtype=jnp.float32)
    # spatial 7x7 conv: 2 input channels (avg, max), 1 output channel, with bias
    conv_w = 0.05 * jax.random.normal(k3, (2, 7, 7), dtype=jnp.float32)
    conv_b = 0.05 * jax.random.normal(k4, (1,), dtype=jnp.float32)

    out = jax.block_until_ready(cbam_pallas(x, w1, w2, conv_w, conv_b))
    ref = cbam_reference(x, w1, w2, conv_w, conv_b)

    assert out.shape == (B, C, H, W)
    err = float(jnp.max(jnp.abs(out - ref)))
    # Tolerance allows for the in-kernel MXU f32 conv matmuls versus the
    # HIGHEST-precision XLA reference conv; real layout/indexing bugs show up
    # as O(1e-1) discrepancies and are still caught.
    assert jnp.allclose(out, ref, atol=1e-2, rtol=1e-2), f"max abs err {err}"
    print("KERNEL_OK")
</pallas_src>

<mosaic_0001>
module attributes {stable_mosaic.version = 11 : i64} {
  func.func @_cbam_kernel(%arg0: i32, %arg1: memref<1x128x256xf32, #tpu.memory_space<vmem>>, %arg2: memref<128x8xf32, #tpu.memory_space<vmem>>, %arg3: memref<128x8xf32, #tpu.memory_space<vmem>>, %arg4: memref<2x256x256xf32, #tpu.memory_space<vmem>>, %arg5: memref<1xf32, #tpu.memory_space<smem>>, %arg6: memref<1x128x256xf32, #tpu.memory_space<vmem>>) attributes {dimension_semantics = [#tpu.dimension_semantics<parallel>], iteration_bounds = array<i64: 2>, scalar_prefetch = 0 : i64, scratch_operands = 0 : i64, tpu.core_type = #tpu.core_type<tc>, window_params = [{transform_indices = @transform_0, window_bounds = array<i64: 1, 128, 256>}, {pipeline_mode = #tpu.pipeline_mode<synchronous>, transform_indices = @transform_1, window_bounds = array<i64: 128, 8>}, {pipeline_mode = #tpu.pipeline_mode<synchronous>, transform_indices = @transform_2, window_bounds = array<i64: 128, 8>}, {pipeline_mode = #tpu.pipeline_mode<synchronous>, transform_indices = @transform_3, window_bounds = array<i64: 2, 256, 256>}, {transform_indices = @transform_4, window_bounds = array<i64: 1>}, {transform_indices = @transform_5, window_bounds = array<i64: 1, 128, 256>}]} {
    %c0 = arith.constant 0 : index
    %c0_0 = arith.constant 0 : index
    %c0_1 = arith.constant 0 : index
    %0 = vector.load %arg1[%c0, %c0_0, %c0_1] : memref<1x128x256xf32, #tpu.memory_space<vmem>>, vector<1x128x256xf32>
    %1 = vector.shape_cast %0 : vector<1x128x256xf32> to vector<128x256xf32>
    %cst = arith.constant dense<0.000000e+00> : vector<128xf32>
    %2 = vector.multi_reduction <add>, %1, %cst [1] : vector<128x256xf32> to vector<128xf32>
    %3 = vector.shape_cast %2 : vector<128xf32> to vector<128x1xf32>
    %cst_2 = arith.constant 3.906250e-03 : f32
    %4 = vector.broadcast %cst_2 : f32 to vector<128x1xf32>
    %5 = arith.mulf %3, %4 : vector<128x1xf32>
    %cst_3 = arith.constant dense<0xFF800000> : vector<128xf32>
    %6 = vector.multi_reduction <maximumf>, %1, %cst_3 [1] : vector<128x256xf32> to vector<128xf32>
    %7 = vector.shape_cast %6 : vector<128xf32> to vector<128x1xf32>
    %c0_4 = arith.constant 0 : index
    %c0_5 = arith.constant 0 : index
    %8 = vector.load %arg2[%c0_4, %c0_5] : memref<128x8xf32, #tpu.memory_space<vmem>>, vector<128x8xf32>
    %9 = vector.broadcast %5 : vector<128x1xf32> to vector<128x8xf32>
    %10 = arith.mulf %8, %9 : vector<128x8xf32>
    %cst_6 = arith.constant dense<0.000000e+00> : vector<8xf32>
    %11 = vector.multi_reduction <add>, %10, %cst_6 [0] : vector<128x8xf32> to vector<8xf32>
    %12 = vector.shape_cast %11 : vector<8xf32> to vector<1x8xf32>
    %c0_7 = arith.constant 0 : index
    %c0_8 = arith.constant 0 : index
    %13 = vector.load %arg2[%c0_7, %c0_8] : memref<128x8xf32, #tpu.memory_space<vmem>>, vector<128x8xf32>
    %14 = vector.broadcast %7 : vector<128x1xf32> to vector<128x8xf32>
    %15 = arith.mulf %13, %14 : vector<128x8xf32>
    %cst_9 = arith.constant dense<0.000000e+00> : vector<8xf32>
    %16 = vector.multi_reduction <add>, %15, %cst_9 [0] : vector<128x8xf32> to vector<8xf32>
    %17 = vector.shape_cast %16 : vector<8xf32> to vector<1x8xf32>
    %cst_10 = arith.constant 0.000000e+00 : f32
    %18 = vector.broadcast %cst_10 : f32 to vector<1x8xf32>
    %19 = arith.maximumf %12, %18 : vector<1x8xf32>
    %cst_11 = arith.constant 0.000000e+00 : f32
    %20 = vector.broadcast %cst_11 : f32 to vector<1x8xf32>
    %21 = arith.maximumf %17, %20 : vector<1x8xf32>
    %22 = arith.addf %19, %21 : vector<1x8xf32>
    %c0_12 = arith.constant 0 : index
    %c0_13 = arith.constant 0 : index
    %23 = vector.load %arg3[%c0_12, %c0_13] : memref<128x8xf32, #tpu.memory_space<vmem>>, vector<128x8xf32>
    %24 = vector.broadcast %22 : vector<1x8xf32> to vector<128x8xf32>
    %25 = arith.mulf %23, %24 : vector<128x8xf32>
    %cst_14 = arith.constant dense<0.000000e+00> : vector<128xf32>
    %26 = vector.multi_reduction <add>, %25, %cst_14 [1] : vector<128x8xf32> to vector<128xf32>
    %27 = vector.shape_cast %26 : vector<128xf32> to vector<128x1xf32>
    %28 = arith.negf %27 : vector<128x1xf32>
    %29 = math.exp %28 : vector<128x1xf32>
    %cst_15 = arith.constant 1.000000e+00 : f32
    %30 = vector.broadcast %cst_15 : f32 to vector<128x1xf32>
    %31 = arith.addf %30, %29 : vector<128x1xf32>
    %32 = arith.divf %30, %31 : vector<128x1xf32>
    %c0_16 = arith.constant 0 : index
    %c0_17 = arith.constant 0 : index
    %c0_18 = arith.constant 0 : index
    %33 = vector.load %arg1[%c0_16, %c0_17, %c0_18] : memref<1x128x256xf32, #tpu.memory_space<vmem>>, vector<1x128x256xf32>
    %34 = vector.shape_cast %33 : vector<1x128x256xf32> to vector<128x256xf32>
    %35 = vector.broadcast %32 : vector<128x1xf32> to vector<128x256xf32>
    %36 = arith.mulf %34, %35 : vector<128x256xf32>
    %cst_19 = arith.constant dense<0.000000e+00> : vector<256xf32>
    %37 = vector.multi_reduction <add>, %36, %cst_19 [0] : vector<128x256xf32> to vector<256xf32>
    %38 = vector.shape_cast %37 : vector<256xf32> to vector<1x256xf32>
    %cst_20 = arith.constant 7.812500e-03 : f32
    %39 = vector.broadcast %cst_20 : f32 to vector<1x256xf32>
    %40 = arith.mulf %38, %39 : vector<1x256xf32>
    %cst_21 = arith.constant dense<0xFF800000> : vector<256xf32>
    %41 = vector.multi_reduction <maximumf>, %36, %cst_21 [0] : vector<128x256xf32> to vector<256xf32>
    %42 = vector.shape_cast %41 : vector<256xf32> to vector<1x256xf32>
    %c0_22 = arith.constant 0 : index
    %c0_23 = arith.constant 0 : index
    %c0_24 = arith.constant 0 : index
    %43 = vector.load %arg4[%c0_22, %c0_23, %c0_24] : memref<2x256x256xf32, #tpu.memory_space<vmem>>, vector<1x256x256xf32>
    %44 = vector.shape_cast %43 : vector<1x256x256xf32> to vector<256x256xf32>
    %cst_25 = arith.constant dense<0.000000e+00> : vector<1x256xf32>
    %45 = tpu.matmul %40, %44, %cst_25 {dimension_numbers = #tpu.dot_dimension_numbers<[1], [0], [0], [1], [0, 0, 1, 1], [], []>} : vector<1x256xf32>, vector<256x256xf32>, vector<1x256xf32> -> vector<1x256xf32>
    %c1 = arith.constant 1 : index
    %c0_26 = arith.constant 0 : index
    %c0_27 = arith.constant 0 : index
    %46 = vector.load %arg4[%c1, %c0_26, %c0_27] : memref<2x256x256xf32, #tpu.memory_space<vmem>>, vector<1x256x256xf32>
    %47 = vector.shape_cast %46 : vector<1x256x256xf32> to vector<256x256xf32>
    %cst_28 = arith.constant dense<0.000000e+00> : vector<1x256xf32>
    %48 = tpu.matmul %42, %47, %cst_28 {dimension_numbers = #tpu.dot_dimension_numbers<[1], [0], [0], [1], [0, 0, 1, 1], [], []>} : vector<1x256xf32>, vector<256x256xf32>, vector<1x256xf32> -> vector<1x256xf32>
    %49 = arith.addf %45, %48 : vector<1x256xf32>
    %c0_29 = arith.constant 0 : index
    %50 = memref.load %arg5[%c0_29] : memref<1xf32, #tpu.memory_space<smem>>
    %51 = vector.broadcast %50 : f32 to vector<1x256xf32>
    %52 = arith.addf %49, %51 : vector<1x256xf32>
    %53 = arith.negf %52 : vector<1x256xf32>
    %54 = math.exp %53 : vector<1x256xf32>
    %cst_30 = arith.constant 1.000000e+00 : f32
    %55 = vector.broadcast %cst_30 : f32 to vector<1x256xf32>
    %56 = arith.addf %55, %54 : vector<1x256xf32>
    %57 = arith.divf %55, %56 : vector<1x256xf32>
    %c0_31 = arith.constant 0 : index
    %c0_32 = arith.constant 0 : index
    %c0_33 = arith.constant 0 : index
    %58 = vector.load %arg1[%c0_31, %c0_32, %c0_33] : memref<1x128x256xf32, #tpu.memory_space<vmem>>, vector<1x128x256xf32>
    %59 = vector.shape_cast %58 : vector<1x128x256xf32> to vector<128x256xf32>
    %60 = vector.broadcast %32 : vector<128x1xf32> to vector<128x256xf32>
    %61 = arith.mulf %59, %60 : vector<128x256xf32>
    %62 = vector.broadcast %57 : vector<1x256xf32> to vector<128x256xf32>
    %63 = arith.mulf %61, %62 : vector<128x256xf32>
    %c0_34 = arith.constant 0 : index
    %c0_35 = arith.constant 0 : index
    %c0_36 = arith.constant 0 : index
    %64 = vector.load %arg6[%c0_34, %c0_35, %c0_36] : memref<1x128x256xf32, #tpu.memory_space<vmem>>, vector<1x128x256xf32>
    %65 = vector.shape_cast %64 : vector<1x128x256xf32> to vector<128x256xf32>
    %66 = vector.shape_cast %63 : vector<128x256xf32> to vector<1x128x256xf32>
    tpu.vector_store %arg6[%c0_34, %c0_35, %c0_36], %66 {strides = array<i32>} : memref<1x128x256xf32, #tpu.memory_space<vmem>>, vector<1x128x256xf32>,
    return
  }
  func.func @transform_0(%arg0: i32) -> (i32, i32, i32) {
    %c0_i32 = arith.constant 0 : i32
    %c0_i32_0 = arith.constant 0 : i32
    %c0_i32_1 = arith.constant 0 : i32
    return %arg0, %c0_i32, %c0_i32_0 : i32, i32, i32
  }
  func.func @transform_1(%arg0: i32) -> (i32, i32) {
    %c0_i32 = arith.constant 0 : i32
    %c0_i32_0 = arith.constant 0 : i32
    %c0_i32_1 = arith.constant 0 : i32
    return %c0_i32, %c0_i32_0 : i32, i32
  }
  func.func @transform_2(%arg0: i32) -> (i32, i32) {
    %c0_i32 = arith.constant 0 : i32
    %c0_i32_0 = arith.constant 0 : i32
    %c0_i32_1 = arith.constant 0 : i32
    return %c0_i32, %c0_i32_0 : i32, i32
  }
  func.func @transform_3(%arg0: i32) -> (i32, i32, i32) {
    %c0_i32 = arith.constant 0 : i32
    %c0_i32_0 = arith.constant 0 : i32
    %c0_i32_1 = arith.constant 0 : i32
    %c0_i32_2 = arith.constant 0 : i32
    return %c0_i32, %c0_i32_0, %c0_i32_1 : i32, i32, i32
  }
  func.func @transform_4(%arg0: i32) -> i32 {
    %c0_i32 = arith.constant 0 : i32
    %c0_i32_0 = arith.constant 0 : i32
    return %c0_i32 : i32
  }
  func.func @transform_5(%arg0: i32) -> (i32, i32, i32) {
    %c0_i32 = arith.constant 0 : i32
    %c0_i32_0 = arith.constant 0 : i32
    %c0_i32_1 = arith.constant 0 : i32
    return %arg0, %c0_i32, %c0_i32_0 : i32, i32, i32
  }
}

</mosaic_0001>

<bundles_post_ra>
// kernel: tpu_custom_call.1
= control target key start
LH: loop header
LB: loop body
LE: loop exit
PB: predicated region body
PF: predicated region fallthrough
CT: control target
= control target key end

     0   :  { %s3000_s0 = inlined_call_operand.hbm [shape: f32[2,128,256], index: 0, kind: input, shape index: {}]   ;;  %s3001_s1 = inlined_call_operand.vmem [shape: f32[128,8], index: 1, kind: input, shape index: {}]   ;;  %s3002_s2 = inlined_call_operand.vmem [shape: f32[128,8], index: 2, kind: input, shape index: {}]   ;;  %s3003_s3 = inlined_call_operand.hbm [shape: f32[2,256,256], index: 3, kind: input, shape index: {}]   ;;  %s3004_s4 = inlined_call_operand.<no memory space> [shape: f32[1], index: 4, kind: input, shape index: {}]   ;;  %s3005_s5 = inlined_call_operand.hbm [shape: f32[2,128,256], index: 5, kind: output, shape index: {}]  }
   0x1   :  { %10 = sst [smem:[#allocation2]] %s3004_s4 }
   0x2   :  { %11 = vsyncpa [#allocation4], 0 }
   0x3   :  { %13 = vsyncpa [#allocation4 + $0x1], 0 }
   0x4   :  { %14 = vsyncpa [#allocation7], 0 }
   0x5   :  { %15 = vsyncpa [#allocation5], 0 }
   0x6   :  { %17 = vsyncpa [#allocation5 + $0x1], 0  ;;  %s1896_s20 = smov 0   ;;  %s1898_s21 = smov 0  }
   0x7   :  { %s1900_s22 = smov 0   ;;  %s1902_s23 = smov 0  }
   0x8 LB: > { %s1917_s4 = sadd.s32 4294967295, %s1856_s23   ;;  %s1531_s24 = sadd.s32 4294967294, %s1856_s23   ;;  %s1856_s23 = sphi %s1902_s23, %s3075_s23   ;;  %s1852_s22 = sphi %s1900_s22, %s3074_s22   ;;  %s1848_s21 = sphi %s1898_s21, %s3073_s21   ;;  %s1844_s20 = sphi %s1896_s20, %s3072_s20  }
   0x9   : > { %p43_p0 = scmp.ne.s32.totalorder %s1848_s21, %s1844_s20  ;;  %p44_p1 = scmp.eq.s32.totalorder %s1917_s4, 0 }
   0xa   : > { %p151_p2 = scmp.eq.s32.totalorder %s1917_s4, 1  ;;  %p157_p3 = scmp.eq.s32.totalorder %s1531_s24, 1 }
   0xb   : > { %p1926_p4 = por %p44_p1, %p43_p0  ;;  %p1532_p5 = scmp.ge.s32.totalorder %s1856_s23, 1 }
   0xc   : > { %p1931_p6 = por %p157_p3, %p43_p0  ;;  %p164_p7 = scmp.lt.s32.totalorder %s1856_s23, 3 }
   0xd   : > { %s181_s29 = sshll.u32 %s3003_s3, 4  ;;  %s1858_s6 = smov [#allocation6]   ;;  %s182_s29 = int_to_ptr.hbm [resolvable:$true] %s181_s29 }
   0xe   : > { %p1939_p8 = pnand %p1532_p5, %p164_p7  ;;  %s183_s7 = sshll.u32 %s1858_s6, 4  ;;  %s184_s7 = int_to_ptr.vmem [resolvable:$true] %s183_s7 }
   0xf   : > { %s1949_s8 = sadd.s32 1, %s1856_s23   ;;  %s1859_s9 = smov 256  }
  0x10   : > { %p1575_p9 = pneg %p1939_p8  ;;  %s1860_s10 = smov 16  }
  0x11   : > { %s27_s11 = ssub.s32 %s1856_s23, %s1949_s8  ;;  %s30_s12 = sadd.s32 1, %s1852_s22 }
  0x12   : > { %p1576_p10 = pnand %p1575_p9, %p44_p1  ;;  %p28_p12 = scmp.eq.s32.totalorder %s27_s11, 0 }
  0x13   : > { %p37_p13 = scmp.ne.s32.totalorder %s1852_s22, %s1848_s21  ;;  %p38_p0 = scmp.eq.s32.totalorder %s1856_s23, 0 }
  0x14   : > { %1578 = dma.hbm_to_vmem [thread:$0]  (!%p1576_p10), %s182_s29, 16384, %s184_s7, [#allocation7], %s1859_s9, %s1859_s9, %s1860_s10  }
  0x15   : > { %s1961_s13 = scalar_select %p28_p12, %s1852_s22, %s30_s12  }
  0x16   : > { %p1965_p3 = por %p151_p2, %p37_p13  ;;  %p1588_p5 = scmp.lt.s32.totalorder %s1856_s23, 2 }
  0x17   : > { %s200_s15 = sand.u32 1, %s1852_s22   ;;  %s1565_s16 = sshll.u32 %s1856_s23, 8 }
  0x18   : > { %p39_p7 = por %p38_p0, %p37_p13  ;;  %s1535_s17 = sshll.u32 %s200_s15, 8 }
  0x19   : > { %s209_s24 = scalar_lea.hbm %s3000_s0, %s1565_s16  ;;  %s204_s28 = scalar_lea.vmem [#allocation3], %s1535_s17 }
  0x1a   : > { %s210_s27 = sshll.u32 %s209_s24, 4  ;;  %s212_s29 = sshll.u32 %s204_s28, 4  ;;  %s211_s27 = int_to_ptr.hbm [resolvable:$true] %s210_s27  ;;  %s213_s29 = int_to_ptr.vmem [resolvable:$true] %s212_s29 }
  0x1b   : > { %p1975_p9 = pnand %p1588_p5, %p39_p7  ;;  %s201_s7 = scalar_lea.sflag [#allocation4], %s200_s15 }
  0x1c   : > { %s1756_s11 = sshra.s32 %s211_s27, 4  ;;  %s1763_s17 = scalar_lea.hbm %s3000_s0, 512  ;;  %s1757_s11 = int_to_ptr.hbm [resolvable:$true] %s1756_s11 }
  0x1d   : > { %s1758_s12 = scalar_lea.hbm %s1757_s11, 256  ;;  %p1760_p10 = pneg %p1975_p9 }
  0x1e   : > { %p1759_p2 = scmp.ne.s32.totalorder %s1757_s11, %s1758_s12  ;;  %p1764_p0 = scmp.lt.s32.totalorder %s1757_s11, %s3000_s0 }
  0x1f   : > { %p1765_p5 = scmp.lt.s32.totalorder %s1763_s17, %s1758_s12 }
  0x20   : > { %p1761_p12 = pnand %p1760_p10, %p1759_p2 }
  0x21   : > { %p1766_p7 = por %p1765_p5, %p1764_p0 }
  0x22   : > { %p1762_p13 = pneg %p1761_p12 }
  0x24   : > { %p1767_p11 = pnand %p1766_p7, %p1762_p13 }
  0x26   : > { %1770 = shalt.err (!%p1767_p11)
}
  0x27   : > { %1582 = dma.hbm_to_vmem [thread:$0]  (!%p1975_p9), %s211_s27, 4096, %s213_s29, %s201_s7, %s1859_s9, %s1859_s9, %s1860_s10  }
  0x28   : > { %224 = sbr.rel (%p1939_p8) target bundleno = 708 (0x2c4), region = 40  ;;  %s1995_s15 = sand.u32 (!%p1939_p8), 1, %s1848_s21  }
  0x29   : > { %s1539_s28 = sshll.u32 (!%p1939_p8), %s1995_s15, 8  ;;  %s227_s11 = scalar_lea.sflag (!%p1939_p8), [#allocation4], %s1995_s15 }
  0x2a   : > { %s2001_s12 = scalar_lea.vmem (!%p1939_p8), [#allocation3], %s1539_s28 }
  0x2d   : > { %1831 = dma.done.wait (%p1926_p4), %s227_s11, 4096  }
  0x2e   : > { %1833 = vsyncadd (%p1926_p4), %s227_s11, 4294963200 }
  0x2f   : > { %1835 = dma.done.wait (%p44_p1), [#allocation7], 16384  }
  0x30   : > { %1837 = vsyncadd (%p44_p1), [#allocation7], 4294950912  ;;  %v2012_v0 = vld [vmem:[%s2001_s12 + $0x20] sm:$0xff]  ;;  %v2015_v1 = vld [vmem:[%s2001_s12 + $0x28] sm:$0xff]  ;;  %vm439_vm0 = vcmask 64512   ;;  %s2905_s16 = scalar_lea.vmem [#allocation8], %s1539_s28 }
  0x31   : > { %v2018_v2 = vld [vmem:[%s2001_s12] sm:$0xff]  ;;  %v301_v3 = vadd.f32 %v2015_v1, %v2012_v0  ;;  %v2023_v4 = vld [vmem:[%s2001_s12 + $0x8] sm:$0xff]  ;;  %v2026_v5 = vld [vmem:[%s2001_s12 + $0x10] sm:$0xff]  ;;  %v365_v17 = vmax.f32 %v2012_v0, %v2015_v1  ;;  %s1566_s28 = sshll.u32 %s1917_s4, 8  ;;  %s1445_s4 = sshll.u32 %s2905_s16, 4  ;;  %s1446_s4 = int_to_ptr.vmem [resolvable:$true] %s1445_s4 }
  0x32   : > { %v2029_v6 = vld [vmem:[%s2001_s12 + $0x18] sm:$0xff]  ;;  %v295_v7 = vadd.f32 %v2023_v4, %v2018_v2  ;;  %v269_v9 = vld [vmem:[%s2001_s12 + $0x30] sm:$0xff]  ;;  %v359_v11 = vmax.f32 %v2018_v2, %v2023_v4  ;;  %v271_v14 = vld [vmem:[%s2001_s12 + $0x40] sm:$0xff]  ;;  %s1444_s19 = scalar_lea.hbm %s3005_s5, %s1566_s28  ;;  %s1433_s11 = scalar_lea.sflag [#allocation5], %s1995_s15 }
  0x33   : > { %v362_v8 = vmax.f32 %v2026_v5, %v2029_v6  ;;  %302 = vadd.xlane.f32.xlu1 %v301_v3  ;;  %v270_v10 = vld [vmem:[%s2001_s12 + $0x38] sm:$0xff]  ;;  %v298_v12 = vadd.f32 %v2029_v6, %v2026_v5  ;;  %v272_v15 = vld [vmem:[%s2001_s12 + $0x48] sm:$0xff]  ;;  %v273_v19 = vld [vmem:[%s2001_s12 + $0x50] sm:$0xff]  ;;  %s1447_s24 = sshll.u32 %s1444_s19, 4  ;;  %s1806_s27 = scalar_lea.hbm %s3005_s5, 512  ;;  %s1448_s24 = int_to_ptr.hbm [resolvable:$true] %s1447_s24 }
  0x34   : > { %296 = vadd.xlane.f32.xlu0 %v295_v7  ;;  %v304_v13 = vadd.f32 %v270_v10, %v269_v9  ;;  %v307_v16 = vadd.f32 %v272_v15, %v271_v14  ;;  %v368_v18 = vmax.f32 %v269_v9, %v270_v10  ;;  %v274_v20 = vld [vmem:[%s2001_s12 + $0x58] sm:$0xff]  ;;  %v275_v21 = vld [vmem:[%s2001_s12 + $0x60] sm:$0xff]  ;;  %v276_v22 = vld [vmem:[%s2001_s12 + $0x68] sm:$0xff]  ;;  %v371_v23 = vmax.f32 %v271_v14, %v272_v15  ;;  %s1800_s25 = sshra.s32 %s1448_s24, 4  ;;  %s1801_s25 = int_to_ptr.hbm [resolvable:$true] %s1800_s25 }
  0x35   : > { %363 = vmax.xlane.f32.xlu2 %v362_v8  ;;  %v310_v24 = vadd.f32 %v274_v20, %v273_v19  ;;  %v313_v25 = vadd.f32 %v276_v22, %v275_v21  ;;  %v277_v26 = vld [vmem:[%s2001_s12 + $0x70] sm:$0xff]  ;;  %v278_v27 = vld [vmem:[%s2001_s12 + $0x78] sm:$0xff]  ;;  %v374_v29 = vmax.f32 %v273_v19, %v274_v20  ;;  %v377_v30 = vmax.f32 %v275_v21, %v276_v22  ;;  %v279_v31 = vld [vmem:[%s2001_s12 + $0x80] sm:$0xff]  ;;  %s1802_s30 = scalar_lea.hbm %s1801_s25, 256  ;;  %p1807_p11 = scmp.lt.s32.totalorder %s1801_s25, %s3005_s5 }
  0x36   : > { %v316_v28 = vadd.f32 %v278_v27, %v277_v26  ;;  %v280_v32 = vld [vmem:[%s2001_s12 + $0x88] sm:$0xff]  ;;  %v281_v33 = vld [vmem:[%s2001_s12 + $0x90] sm:$0xff]  ;;  %v282_v34 = vld [vmem:[%s2001_s12 + $0x98] sm:$0xff]  ;;  %v380_v35 = vmax.f32 %v277_v26, %v278_v27  ;;  %p1803_p1 = scmp.ne.s32.totalorder %s1801_s25, %s1802_s30  ;;  %p1808_p9 = scmp.lt.s32.totalorder %s1806_s27, %s1802_s30 }
  0x37   : > { %v319_v36 = vadd.f32 %v280_v32, %v279_v31  ;;  %v322_v37 = vadd.f32 %v282_v34, %v281_v33  ;;  %v283_v38 = vld [vmem:[%s2001_s12 + $0xa0] sm:$0xff]  ;;  %v284_v39 = vld [vmem:[%s2001_s12 + $0xa8] sm:$0xff]  ;;  %v383_v41 = vmax.f32 %v279_v31, %v280_v32  ;;  %v386_v42 = vmax.f32 %v281_v33, %v282_v34  ;;  %v285_v43 = vld [vmem:[%s2001_s12 + $0xb0] sm:$0xff] }
  0x38   : > { %v325_v40 = vadd.f32 %v284_v39, %v283_v38  ;;  %v286_v44 = vld [vmem:[%s2001_s12 + $0xb8] sm:$0xff]  ;;  %v287_v45 = vld [vmem:[%s2001_s12 + $0xc0] sm:$0xff]  ;;  %v288_v46 = vld [vmem:[%s2001_s12 + $0xc8] sm:$0xff]  ;;  %v389_v47 = vmax.f32 %v283_v38, %v284_v39  ;;  %p1804_p4 = pnand %p1803_p1, %p1965_p3  ;;  %p1809_p2 = por %p1808_p9, %p1807_p11 }
  0x39   : > { %v328_v48 = vadd.f32 %v286_v44, %v285_v43  ;;  %v331_v49 = vadd.f32 %v288_v46, %v287_v45  ;;  %v289_v50 = vld [vmem:[%s2001_s12 + $0xd0] sm:$0xff]  ;;  %v290_v51 = vld [vmem:[%s2001_s12 + $0xd8] sm:$0xff]  ;;  %v392_v53 = vmax.f32 %v285_v43, %v286_v44  ;;  %v395_v54 = vmax.f32 %v287_v45, %v288_v46  ;;  %v291_v55 = vld [vmem:[%s2001_s12 + $0xe0] sm:$0xff] }
  0x3a   : > { %v334_v52 = vadd.f32 %v290_v51, %v289_v50  ;;  %v292_v56 = vld [vmem:[%s2001_s12 + $0xe8] sm:$0xff]  ;;  %v293_v57 = vld [vmem:[%s2001_s12 + $0xf0] sm:$0xff]  ;;  %v294_v58 = vld [vmem:[%s2001_s12 + $0xf8] sm:$0xff]  ;;  %v398_v59 = vmax.f32 %v289_v50, %v290_v51  ;;  %p1805_p8 = pneg %p1804_p4 }
  0x3b   : > { %360 = vmax.xlane.f32.xlu1 %v359_v11  ;;  %v337_v60 = vadd.f32 %v292_v56, %v291_v55  ;;  %v340_v61 = vadd.f32 %v294_v58, %v293_v57  ;;  %v404_v62 = vmax.f32 %v293_v57, %v294_v58  ;;  %v401_v63 = vmax.f32 %v291_v55, %v292_v56  ;;  %v410_v32 = vld [vmem:[%s3001_s1 + $0x18] sm:$0xff]  ;;  %v412_v44 = vld [vmem:[%s3001_s1 + $0x28] sm:$0xff]  ;;  %v413_v55 = vld [vmem:[%s3001_s1 + $0x30] sm:$0xff] }
  0x3c   : > { %299 = vadd.xlane.f32.xlu0 %v298_v12  ;;  %p1810_p10 = pnand %p1809_p2, %p1805_p8 }
  0x3d   : > { %305 = vadd.xlane.f32.xlu2 %v304_v13 }
  0x43   : > { %308 = vadd.xlane.f32.xlu1 %v307_v16 }
  0x44   : > { %366 = vmax.xlane.f32.xlu0 %v365_v17 }
  0x45   : > { %369 = vmax.xlane.f32.xlu2 %v368_v18 }
  0x4b   : > { %372 = vmax.xlane.f32.xlu1 %v371_v23  ;;  %v408_v23 = vld [vmem:[%s3001_s1 + $0x8] sm:$0xff] }
  0x4c   : > { %311 = vadd.xlane.f32.xlu0 %v310_v24  ;;  %v407_v24 = vld [vmem:[%s3001_s1] sm:$0xff] }
  0x4d   : > { %314 = vadd.xlane.f32.xlu2 %v313_v25 }
  0x53   : > { %317 = vadd.xlane.f32.xlu1 %v316_v28  ;;  %v409_v28 = vld [vmem:[%s3001_s1 + $0x10] sm:$0xff] }
  0x54   : > { %375 = vmax.xlane.f32.xlu0 %v374_v29 }
  0x55   : > { %378 = vmax.xlane.f32.xlu2 %v377_v30 }
  0x5b   : > { %381 = vmax.xlane.f32.xlu1 %v380_v35 }
  0x5c   : > { %320 = vadd.xlane.f32.xlu0 %v319_v36 }
  0x5d   : > { %323 = vadd.xlane.f32.xlu2 %v322_v37 }
  0x63   : > { %326 = vadd.xlane.f32.xlu1 %v325_v40  ;;  %v411_v40 = vld [vmem:[%s3001_s1 + $0x20] sm:$0xff] }
  0x64   : > { %384 = vmax.xlane.f32.xlu0 %v383_v41 }
  0x65   : > { %387 = vmax.xlane.f32.xlu2 %v386_v42 }
  0x6b   : > { %390 = vmax.xlane.f32.xlu1 %v389_v47 }
  0x6c   : > { %329 = vadd.xlane.f32.xlu0 %v328_v48 }
  0x6d   : > { %332 = vadd.xlane.f32.xlu2 %v331_v49 }
  0x73   : > { %335 = vadd.xlane.f32.xlu1 %v334_v52 }
  0x74   : > { %393 = vmax.xlane.f32.xlu0 %v392_v53 }
  0x75   : > { %396 = vmax.xlane.f32.xlu2 %v395_v54 }
  0x7b   : > { %399 = vmax.xlane.f32.xlu1 %v398_v59 }
  0x7c   : > { %338 = vadd.xlane.f32.xlu0 %v337_v60 }
  0x7d   : > { %341 = vadd.xlane.f32.xlu2 %v340_v61 }
  0x83   : > { %405 = vmax.xlane.f32.xlu1 %v404_v62 }
  0x84   : > { %402 = vmax.xlane.f32.xlu0 %v401_v63 }
  0xa6   : > { %v303_v3 = vpop.xlane.xlu1 %302 }
  0xa7   : > { %v297_v7 = vpop.xlane.xlu0 %296  ;;  %v345_v26 = vmul.f32 0.00390625, %v303_v3  ;;  %v414_v3 = vld [vmem:[%s3001_s1 + $0x38] sm:$0xff] }
  0xa8   : > { %v364_v8 = vpop.xlane.xlu2 %363  ;;  %v343_v22 = vmul.f32 0.00390625, %v297_v7 }
  0xa9   : > { %v425_v37 = vmul.f32 %v409_v28, %v345_v26  ;;  %v478_v38 = vmul.f32 %v408_v23, %v364_v8  ;;  %v416_v26 = vld [vmem:[%s3001_s1 + $0x48] sm:$0xff] }
  0xaa   : > { %v423_v27 = vmul.f32 %v407_v24, %v343_v22 }
  0xab   : > { %v443_v45 = vsel %vm439_vm0, %v425_v37, 0.0  ;;  %v494_v48 = vsel %vm439_vm0, %v478_v38, 0.0 }
  0xac   : > { %v440_v35 = vsel %vm439_vm0, %v423_v27, 0.0 }
  0xae   : > { %v361_v9 = vpop.xlane.xlu1 %360 }
  0xaf   : > { %v300_v10 = vpop.xlane.xlu0 %299  ;;  %v477_v41 = vmul.f32 %v407_v24, %v361_v9 }
  0xb0   : > { %v306_v11 = vpop.xlane.xlu2 %305  ;;  %v344_v18 = vmul.f32 0.00390625, %v300_v10 }
  0xb1   : > { %v346_v30 = vmul.f32 0.00390625, %v306_v11  ;;  %v493_v50 = vsel %vm439_vm0, %v477_v41, 0.0 }
  0xb2   : > { %v424_v25 = vmul.f32 %v408_v23, %v344_v18  ;;  %v495_v62 = vadd.f32 %v494_v48, %v493_v50 }
  0xb3   : > { %v426_v42 = vmul.f32 %v410_v32, %v346_v30 }
  0xb4   : > { %v441_v29 = vsel %vm439_vm0, %v424_v25, 0.0 }
  0xb5   : > { %v442_v39 = vadd.f32 %v441_v29, %v440_v35  ;;  %v445_v51 = vsel %vm439_vm0, %v426_v42, 0.0 }
  0xb6   : > { %v309_v12 = vpop.xlane.xlu1 %308 }
  0xb7   : > { %v367_v13 = vpop.xlane.xlu0 %366  ;;  %v347_v36 = vmul.f32 0.00390625, %v309_v12  ;;  %v444_v49 = vadd.f32 %v443_v45, %v442_v39 }
  0xb8   : > { %v370_v14 = vpop.xlane.xlu2 %369  ;;  %v479_v46 = vmul.f32 %v409_v28, %v367_v13  ;;  %v415_v13 = vld [vmem:[%s3001_s1 + $0x40] sm:$0xff] }
  0xb9   : > { %v427_v47 = vmul.f32 %v411_v40, %v347_v36  ;;  %v480_v59 = vmul.f32 %v410_v32, %v370_v14  ;;  %v446_v63 = vadd.f32 %v445_v51, %v444_v49 }
  0xba   : > { %v496_v58 = vsel %vm439_vm0, %v479_v46, 0.0 }
  0xbb   : > { %v447_v60 = vsel %vm439_vm0, %v427_v47, 0.0  ;;  %v497_v11 = vadd.f32 %v496_v58, %v495_v62  ;;  %v498_v14 = vsel %vm439_vm0, %v480_v59, 0.0 }
  0xbc   : > { %v448_v12 = vadd.f32 %v447_v60, %v446_v63 }
  0xbd   : > { %v499_v25 = vadd.f32 %v498_v14, %v497_v11 }
  0xbe   : > { %v373_v15 = vpop.xlane.xlu1 %372 }
  0xbf   : > { %v312_v16 = vpop.xlane.xlu0 %311  ;;  %v481_v7 = vmul.f32 %v411_v40, %v373_v15 }
  0xc0   : > { %v315_v17 = vpop.xlane.xlu2 %314  ;;  %v348_v43 = vmul.f32 0.00390625, %v312_v16 }
  0xc1   : > { %v349_v52 = vmul.f32 0.00390625, %v315_v17 }
  0xc2   : > { %v428_v53 = vmul.f32 %v412_v44, %v348_v43 }
  0xc3   : > { %v429_v9 = vmul.f32 %v413_v55, %v349_v52  ;;  %v419_v52 = vld [vmem:[%s3001_s1 + $0x60] sm:$0xff] }
  0xc4   : > { %v449_v8 = vsel %vm439_vm0, %v428_v53, 0.0 }
  0xc5   : > { %v450_v18 = vadd.f32 %v449_v8, %v448_v12  ;;  %v451_v22 = vsel %vm439_vm0, %v429_v9, 0.0 }
  0xc6   : > { %v318_v19 = vpop.xlane.xlu1 %317 }
  0xc7   : > { %v376_v20 = vpop.xlane.xlu0 %375  ;;  %v350_v61 = vmul.f32 0.00390625, %v318_v19  ;;  %v500_v19 = vsel %vm439_vm0, %v481_v7, 0.0  ;;  %v452_v35 = vadd.f32 %v451_v22, %v450_v18  ;;  %v421_v22 = vld [vmem:[%s3001_s1 + $0x70] sm:$0xff] }
  0xc8   : > { %v2067_v21 = vpop.xlane.xlu2 %378  ;;  %v482_v16 = vmul.f32 %v412_v44, %v376_v20 }
  0xc9   : > { %v430_v17 = vmul.f32 %v414_v3, %v350_v61  ;;  %v483_v20 = vmul.f32 %v413_v55, %v2067_v21  ;;  %v418_v21 = vld [vmem:[%s3001_s1 + $0x58] sm:$0xff]  ;;  %v420_v61 = vld [vmem:[%s3001_s1 + $0x68] sm:$0xff] }
  0xca   : > { %v502_v29 = vsel %vm439_vm0, %v482_v16, 0.0 }
  0xcb   : > { %v453_v30 = vsel %vm439_vm0, %v430_v17, 0.0  ;;  %v504_v42 = vsel %vm439_vm0, %v483_v20, 0.0 }
  0xcc   : > { %v454_v41 = vadd.f32 %v453_v30, %v452_v35 }
  0xce   : > { %v382_v31 = vpop.xlane.xlu1 %381 }
  0xcf   : > { %v321_v33 = vpop.xlane.xlu0 %320  ;;  %v484_v36 = vmul.f32 %v414_v3, %v382_v31 }
  0xd0   : > { %v324_v34 = vpop.xlane.xlu2 %323  ;;  %v351_v10 = vmul.f32 0.00390625, %v321_v33  ;;  %v501_v33 = vadd.f32 %v500_v19, %v499_v25 }
  0xd1   : > { %v352_v15 = vmul.f32 0.00390625, %v324_v34  ;;  %v417_v34 = vld [vmem:[%s3001_s1 + $0x50] sm:$0xff]  ;;  %v506_v46 = vsel %vm439_vm0, %v484_v36, 0.0 }
  0xd2   : > { %v431_v23 = vmul.f32 %v415_v13, %v351_v10  ;;  %v503_v40 = vadd.f32 %v502_v29, %v501_v33 }
  0xd3   : > { %v432_v38 = vmul.f32 %v416_v26, %v352_v15  ;;  %v422_v15 = vld [vmem:[%s3001_s1 + $0x78] sm:$0xff] }
  0xd4   : > { %v455_v37 = vsel %vm439_vm0, %v431_v23, 0.0  ;;  %v505_v50 = vadd.f32 %v504_v42, %v503_v40 }
  0xd5   : > { %v456_v45 = vadd.f32 %v455_v37, %v454_v41  ;;  %v457_v47 = vsel %vm439_vm0, %v432_v38, 0.0 }
  0xd6   : > { %v327_v54 = vpop.xlane.xlu1 %326  ;;  %v507_v59 = vadd.f32 %v506_v46, %v505_v50 }
  0xd7   : > { %v385_v56 = vpop.xlane.xlu0 %384  ;;  %v353_v32 = vmul.f32 0.00390625, %v327_v54  ;;  %v458_v60 = vadd.f32 %v457_v47, %v456_v45 }
  0xd8   : > { %v388_v57 = vpop.xlane.xlu2 %387  ;;  %v485_v43 = vmul.f32 %v415_v13, %v385_v56 }
  0xd9   : > { %v433_v44 = vmul.f32 %v417_v34, %v353_v32  ;;  %v486_v55 = vmul.f32 %v416_v26, %v388_v57 }
  0xda   : > { %v508_v54 = vsel %vm439_vm0, %v485_v43, 0.0 }
  0xdb   : > { %v459_v56 = vsel %vm439_vm0, %v433_v44, 0.0  ;;  %v509_v7 = vadd.f32 %v508_v54, %v507_v59  ;;  %v510_v9 = vsel %vm439_vm0, %v486_v55, 0.0 }
  0xdc   : > { %v460_v8 = vadd.f32 %v459_v56, %v458_v60 }
  0xdd   : > { %v511_v16 = vadd.f32 %v510_v9, %v509_v7  ;;  %v533_v7 = vld [vmem:[%s3002_s2] sm:$0xff] }
  0xde   : > { %v391_v24 = vpop.xlane.xlu1 %390 }
  0xdf   : > { %v330_v27 = vpop.xlane.xlu0 %329  ;;  %v487_v62 = vmul.f32 %v417_v34, %v391_v24 }
  0xe0   : > { %v333_v28 = vpop.xlane.xlu2 %332  ;;  %v354_v39 = vmul.f32 0.00390625, %v330_v27 }
  0xe1   : > { %v355_v31 = vmul.f32 0.00390625, %v333_v28  ;;  %v512_v12 = vsel %vm439_vm0, %v487_v62, 0.0 }
  0xe2   : > { %v434_v49 = vmul.f32 %v418_v21, %v354_v39  ;;  %v513_v27 = vadd.f32 %v512_v12, %v511_v16  ;;  %v537_v16 = vld [vmem:[%s3002_s2 + $0x20] sm:$0xff] }
  0xe3   : > { %v435_v3 = vmul.f32 %v419_v52, %v355_v31 }
  0xe4   : > { %v461_v63 = vsel %vm439_vm0, %v434_v49, 0.0 }
  0xe5   : > { %v462_v57 = vadd.f32 %v461_v63, %v460_v8  ;;  %v463_v13 = vsel %vm439_vm0, %v435_v3, 0.0  ;;  %v535_v63 = vld [vmem:[%s3002_s2 + $0x10] sm:$0xff]  ;;  %v534_v3 = vld [vmem:[%s3002_s2 + $0x8] sm:$0xff] }
  0xe6   : > { %v336_v48 = vpop.xlane.xlu1 %335 }
  0xe7   : > { %v394_v51 = vpop.xlane.xlu0 %393  ;;  %v356_v58 = vmul.f32 0.00390625, %v336_v48  ;;  %v464_v28 = vadd.f32 %v463_v13, %v462_v57 }
  0xe8   : > { %v397_v53 = vpop.xlane.xlu2 %396  ;;  %v488_v10 = vmul.f32 %v418_v21, %v394_v51 }
  0xe9   : > { %v436_v11 = vmul.f32 %v420_v61, %v356_v58  ;;  %v489_v17 = vmul.f32 %v419_v52, %v397_v53 }
  0xea   : > { %v514_v23 = vsel %vm439_vm0, %v488_v10, 0.0 }
  0xeb   : > { %v465_v24 = vsel %vm439_vm0, %v436_v11, 0.0  ;;  %v515_v32 = vadd.f32 %v514_v23, %v513_v27  ;;  %v516_v35 = vsel %vm439_vm0, %v489_v17, 0.0  ;;  %v536_v17 = vld [vmem:[%s3002_s2 + $0x18] sm:$0xff]  ;;  %v539_v27 = vld [vmem:[%s3002_s2 + $0x30] sm:$0xff] }
  0xec   : > { %v466_v33 = vadd.f32 %v465_v24, %v464_v28 }
  0xed   : > { %v517_v40 = vadd.f32 %v516_v35, %v515_v32  ;;  %v544_v35 = vld [vmem:[%s3002_s2 + $0x58] sm:$0xff] }
  0xee   : > { %v400_v14 = vpop.xlane.xlu1 %399 }
  0xef   : > { %v339_v18 = vpop.xlane.xlu0 %338  ;;  %v490_v29 = vmul.f32 %v420_v61, %v400_v14  ;;  %v538_v14 = vld [vmem:[%s3002_s2 + $0x28] sm:$0xff] }
  0xf0   : > { %v342_v19 = vpop.xlane.xlu2 %341  ;;  %v357_v25 = vmul.f32 0.00390625, %v339_v18 }
  0xf1   : > { %v358_v26 = vmul.f32 0.00390625, %v342_v19  ;;  %v518_v38 = vsel %vm439_vm0, %v490_v29, 0.0 }
  0xf2   : > { %v437_v20 = vmul.f32 %v421_v22, %v357_v25  ;;  %v519_v44 = vadd.f32 %v518_v38, %v517_v40  ;;  %v541_v25 = vld [vmem:[%s3002_s2 + $0x40] sm:$0xff] }
  0xf3   : > { %v438_v30 = vmul.f32 %v422_v15, %v358_v26  ;;  %v540_v26 = vld [vmem:[%s3002_s2 + $0x38] sm:$0xff] }
  0xf4   : > { %v467_v34 = vsel %vm439_vm0, %v437_v20, 0.0 }
  0xf5   : > { %v469_v36 = vsel %vm439_vm0, %v438_v30, 0.0  ;;  %v468_v37 = vadd.f32 %v467_v34, %v466_v33  ;;  %v543_v34 = vld [vmem:[%s3002_s2 + $0x50] sm:$0xff] }
  0xf6   : > { %v406_v39 = vpop.xlane.xlu1 %405 }
  0xf7   : > { %v403_v41 = vpop.xlane.xlu0 %402  ;;  %v470_v21 = vadd.f32 %v469_v36, %v468_v37  ;;  %v492_v42 = vmul.f32 %v422_v15, %v406_v39  ;;  %v542_v36 = vld [vmem:[%s3002_s2 + $0x48] sm:$0xff] }
  0xf8   : > { %v491_v43 = vmul.f32 %v421_v22, %v403_v41 }
  0xf9   : > { %v471_v45 = vrot.slane %v470_v21, 4  ;;  %v522_v47 = vsel %vm439_vm0, %v492_v42, 0.0  ;;  %v547_v42 = vld [vmem:[%s3002_s2 + $0x70] sm:$0xff] }
  0xfa   : > { %v520_v46 = vsel %vm439_vm0, %v491_v43, 0.0  ;;  %v546_v43 = vld [vmem:[%s3002_s2 + $0x68] sm:$0xff] }
  0xfb   : > { %v521_v31 = vadd.f32 %v520_v46, %v519_v44  ;;  %v472_v48 = vadd.f32 %v471_v45, %v470_v21  ;;  %v545_v44 = vld [vmem:[%s3002_s2 + $0x60] sm:$0xff] }
  0xfd   : > { %v473_v49 = vrot.slane %v472_v48, 2  ;;  %v523_v50 = vadd.f32 %v522_v47, %v521_v31 }
  0xff   : > { %v474_v51 = vadd.f32 %v473_v49, %v472_v48  ;;  %v524_v52 = vrot.slane %v523_v50, 4 }
 0x101   : > { %v525_v53 = vadd.f32 %v524_v52, %v523_v50  ;;  %v475_v54 = vrot.slane %v474_v51, 1  ;;  %v548_v50 = vld [vmem:[%s3002_s2 + $0x78] sm:$0xff] }
 0x103   : > { %v526_v55 = vrot.slane %v525_v53, 2  ;;  %v476_v58 = vadd.f32 %v475_v54, %v474_v51 }
 0x105   : > { %v527_v56 = vadd.f32 %v526_v55, %v525_v53  ;;  %v530_v61 = vmax.f32 %v476_v58, 0.0 }
 0x107   : > { %v528_v59 = vrot.slane %v527_v56, 1 }
 0x109   : > { %v529_v60 = vadd.f32 %v528_v59, %v527_v56 }
 0x10b   : > { %v531_v62 = vmax.f32 %v529_v60, 0.0 }
 0x10d   : > { %v532_v8 = vadd.f32 %v531_v62, %v530_v61 }
 0x10f   : > { %v551_v9 = vmul.f32 %v535_v63, %v532_v8  ;;  %v550_v10 = vmul.f32 %v534_v3, %v532_v8  ;;  %v549_v11 = vmul.f32 %v533_v7, %v532_v8  ;;  %v554_v18 = vmul.f32 %v538_v14, %v532_v8 }
 0x110   : > { %v553_v19 = vmul.f32 %v537_v16, %v532_v8  ;;  %v552_v22 = vmul.f32 %v536_v17, %v532_v8  ;;  %v557_v28 = vmul.f32 %v541_v25, %v532_v8  ;;  %v556_v29 = vmul.f32 %v540_v26, %v532_v8 }
 0x111   : > { %v571_v57 = vsel %vm439_vm0, %v551_v9, 0.0  ;;  %v568_v12 = vsel %vm439_vm0, %v550_v10, 0.0  ;;  %v565_v13 = vsel %vm439_vm0, %v549_v11, 0.0  ;;  %v580_v15 = vsel %vm439_vm0, %v554_v18, 0.0 }
 0x112   : > { %572 = vadd.xlane.f32.xlu1 %v571_v57  ;;  %569 = vadd.xlane.f32.xlu0 %v568_v12  ;;  %v577_v23 = vsel %vm439_vm0, %v553_v19, 0.0  ;;  %v574_v24 = vsel %vm439_vm0, %v552_v22, 0.0  ;;  %v555_v20 = vmul.f32 %v539_v27, %v532_v8  ;;  %v589_v30 = vsel %vm439_vm0, %v557_v28, 0.0 }
 0x113   : > { %566 = vadd.xlane.f32.xlu2 %v565_v13  ;;  %v586_v32 = vsel %vm439_vm0, %v556_v29, 0.0  ;;  %v560_v37 = vmul.f32 %v544_v35, %v532_v8  ;;  %v559_v38 = vmul.f32 %v543_v34, %v532_v8  ;;  %v558_v39 = vmul.f32 %v542_v36, %v532_v8 }
 0x114   : > { %v583_v33 = vsel %vm439_vm0, %v555_v20, 0.0  ;;  %v563_v45 = vmul.f32 %v547_v42, %v532_v8  ;;  %v562_v46 = vmul.f32 %v546_v43, %v532_v8  ;;  %v561_v47 = vmul.f32 %v545_v44, %v532_v8 }
 0x115   : > { %v598_v40 = vsel %vm439_vm0, %v560_v37, 0.0  ;;  %v595_v41 = vsel %vm439_vm0, %v559_v38, 0.0  ;;  %v592_v21 = vsel %vm439_vm0, %v558_v39, 0.0  ;;  %v564_v51 = vmul.f32 %v548_v50, %v532_v8 }
 0x116   : > { %v607_v31 = vsel %vm439_vm0, %v563_v45, 0.0  ;;  %v604_v48 = vsel %vm439_vm0, %v562_v46, 0.0  ;;  %v601_v49 = vsel %vm439_vm0, %v561_v47, 0.0 }
 0x117   : > { %v610_v52 = vsel %vm439_vm0, %v564_v51, 0.0 }
 0x11a   : > { %581 = vadd.xlane.f32.xlu1 %v580_v15  ;;  %578 = vadd.xlane.f32.xlu0 %v577_v23 }
 0x11b   : > { %575 = vadd.xlane.f32.xlu2 %v574_v24 }
 0x122   : > { %590 = vadd.xlane.f32.xlu1 %v589_v30  ;;  %587 = vadd.xlane.f32.xlu0 %v586_v32 }
 0x123   : > { %584 = vadd.xlane.f32.xlu2 %v583_v33 }
 0x12a   : > { %599 = vadd.xlane.f32.xlu1 %v598_v40  ;;  %596 = vadd.xlane.f32.xlu0 %v595_v41 }
 0x12b   : > { %593 = vadd.xlane.f32.xlu2 %v592_v21 }
 0x132   : > { %608 = vadd.xlane.f32.xlu1 %v607_v31  ;;  %605 = vadd.xlane.f32.xlu0 %v604_v48  ;;  %v1156_v48 = vld [vmem:[#allocation6 + $0x3c0] sm:$0xff] }
 0x133   : > { %602 = vadd.xlane.f32.xlu2 %v601_v49  ;;  %v1125_v49 = vld [vmem:[#allocation6 + $0x2c8] sm:$0xff] }
 0x13b   : > { %611 = vadd.xlane.f32.xlu2 %v610_v52 }
 0x185   : > { %v573_v53 = vpop.xlane.xlu1 %572  ;;  %v570_v54 = vpop.xlane.xlu0 %569 }
 0x186   : > { %v1544_v55 = vmul.f32 -1.442695, %v573_v53  ;;  %v1543_v56 = vmul.f32 -1.442695, %v570_v54  ;;  %v567_v58 = vpop.xlane.xlu2 %566 }
 0x187   : > { %v1542_v59 = vmul.f32 -1.442695, %v567_v58 }
 0x188   : > { %1628 = vpow2.f32 %v1544_v55 }
 0x189   : > { %1630 = vpow2.f32 %v1543_v56 }
 0x18a   : > { %1632 = vpow2.f32 %v1542_v59 }
 0x18d   : > { %v582_v60 = vpop.xlane.xlu1 %581  ;;  %v579_v61 = vpop.xlane.xlu0 %578 }
 0x18e   : > { %v1629_v62 = vpop.eup %1628  ;;  %v1547_v63 = vmul.f32 -1.442695, %v582_v60  ;;  %v576_v3 = vpop.xlane.xlu2 %575  ;;  %v1546_v8 = vmul.f32 -1.442695, %v579_v61 }
 0x18f   : > { %v1631_v7 = vpop.eup %1630  ;;  %v2214_v9 = vadd.f32 1.0, %v1629_v62  ;;  %v1545_v57 = vmul.f32 -1.442695, %v576_v3 }
 0x190   : > { %v1633_v10 = vpop.eup %1632  ;;  %v662_v11 = vadd.f32 1.0, %v1631_v7  ;;  %1634 = vpow2.f32 %v1547_v63 }
 0x191   : > { %1636 = vrcp.f32 %v2214_v9  ;;  %v2217_v12 = vadd.f32 1.0, %v1633_v10  ;;  %v718_v17 = vand.u32 2147483648, %v2214_v9  ;;  %vm712_vm1 = vweird.f32 %v2214_v9 }
 0x192   : > { %1638 = vrcp.f32 %v662_v11  ;;  %v701_v18 = vand.u32 2147483647, %v662_v11  ;;  %v716_v26 = vand.u32 2147483647, %v2214_v9  ;;  %vm697_vm2 = vweird.f32 %v662_v11 }
 0x193   : > { %1640 = vpow2.f32 %v1546_v8  ;;  %v703_v30 = vand.u32 2147483648, %v662_v11  ;;  %v2232_v34 = vor.u32 1.1754944e-38, %v718_v17  ;;  %v686_v41 = vand.u32 2147483647, %v2217_v12  ;;  %v1162_v17 = vld [vmem:[#allocation6 + $0x3f0] sm:$0xff] }
 0x194   : > { %1642 = vpow2.f32 %v1545_v57  ;;  %vm2234_vm3 = vcmp.eq.f32.partialorder %v701_v18, 8.507059e+37  ;;  %v688_v42 = vand.u32 2147483648, %v2217_v12  ;;  %vm682_vm6 = vweird.f32 %v2217_v12  ;;  %v1131_v18 = vld [vmem:[#allocation6 + $0x2f8] sm:$0xff]  ;;  %1184 = vmatpush.msra.mxu1 %v1162_v17  ;;  %v1120_v17 = vld [vmem:[#allocation6 + $0x2a0] sm:$0xff] }
 0x195   : > { %1644 = vrcp.f32 %v2217_v12  ;;  %v591_v13 = vpop.xlane.xlu1 %590  ;;  %v588_v22 = vpop.xlane.xlu0 %587  ;;  %v704_v43 = vor.u32 1.1754944e-38, %v703_v30  ;;  %vm2254_vm7 = vcmp.eq.f32.partialorder %v716_v26, 8.507059e+37  ;;  %vm2267_vm10 = vcmp.eq.f32.partialorder %v686_v41, 8.507059e+37  ;;  %v1163_v26 = vld [vmem:[#allocation6 + $0x3f8] sm:$0xff]  ;;  %1204 = vmatpush.msra.mxu2 %v1131_v18  ;;  %v1128_v30 = vld [vmem:[#allocation6 + $0x2e0] sm:$0xff] }
 0x196   : > { %v1635_v14 = vpop.eup %1634  ;;  %v1550_v24 = vmul.f32 -1.442695, %v591_v13  ;;  %v585_v28 = vpop.xlane.xlu2 %584  ;;  %v1549_v33 = vmul.f32 -1.442695, %v588_v22  ;;  %v689_v54 = vor.u32 1.1754944e-38, %v688_v42  ;;  %1224 = vmatpush.msra.mxu3 %v1163_v26  ;;  %v1152_v18 = vld [vmem:[#allocation6 + $0x3a0] sm:$0xff] }
 0x197   : > { %v2220_v16 = vpop.eup %1636  ;;  %v2223_v19 = vadd.f32 1.0, %v1635_v14  ;;  %v2283_v61 = vmul.f32 -1.442695, %v585_v28  ;;  %v1130_v14 = vld [vmem:[#allocation6 + $0x2f0] sm:$0xff]  ;;  %v1153_v26 = vld [vmem:[#allocation6 + $0x3a8] sm:$0xff] }
 0x198   : > { %v1639_v15 = vpop.eup %1638  ;;  %v708_v23 = vmul.f32 %v2220_v16, %v2214_v9  ;;  %vm713_vm5 = vweird.f32 %v2220_v16  ;;  %1164 = vmatpush.msra.mxu0 %v1130_v14 }
 0x199   : > { %v1641_v25 = vpop.eup %1640  ;;  %v693_v27 = vmul.f32 %v1639_v15, %v662_v11  ;;  %1646 = vrcp.f32 %v2223_v19  ;;  %vm698_vm4 = vweird.f32 %v1639_v15  ;;  %v763_v45 = vand.u32 2147483648, %v2223_v19  ;;  %vm2276_vm11 = vmor %vm712_vm1, %vm713_vm5 }
 0x19a   : > { %v1643_v29 = vpop.eup %1642  ;;  %v709_v20 = vsub.f32 1.0, %v708_v23  ;;  %v2230_v32 = vadd.f32 1.0, %v1641_v25  ;;  %1648 = vpow2.f32 %v1550_v24  ;;  %vm2259_vm8 = vmor %vm697_vm2, %vm698_vm4  ;;  %v761_v55 = vand.u32 2147483647, %v2223_v19  ;;  %1165 = vmatpush.msra.mxu0 %v1128_v30 }
 0x19b   : > { %v1645_v35 = vpop.eup %1644  ;;  %v694_v36 = vsub.f32 1.0, %v693_v27  ;;  %v2238_v38 = vadd.f32 1.0, %v1643_v29  ;;  %vm757_vm12 = vweird.f32 %v2223_v19  ;;  %v2281_v60 = vor.u32 1.1754944e-38, %v763_v45  ;;  %v1159_v45 = vld [vmem:[#allocation6 + $0x3d8] sm:$0xff] }
 0x19c   : > { %v710_v39 = vmul.f32 %v2220_v16, %v709_v20  ;;  %v678_v40 = vmul.f32 %v1645_v35, %v2217_v12  ;;  %1650 = vrcp.f32 %v2230_v32  ;;  %vm683_vm9 = vweird.f32 %v1645_v35 }
 0x19d   : > { %v695_v21 = vmul.f32 %v1639_v15, %v694_v36  ;;  %1652 = vpow2.f32 %v1549_v33  ;;  %vm684_vm13 = vmor %vm682_vm6, %vm683_vm9  ;;  %v746_v7 = vand.u32 2147483647, %v2230_v32  ;;  %v748_v9 = vand.u32 2147483648, %v2230_v32  ;;  %v2314_v25 = vpop.xlane.xlu1 %599  ;;  %v1160_v33 = vld [vmem:[#allocation6 + $0x3e0] sm:$0xff] }
 0x19e   : > { %v679_v44 = vsub.f32 1.0, %v678_v40  ;;  %1654 = vrcp.f32 %v2238_v38  ;;  %v2252_v31 = vadd.f32 %v2220_v16, %v710_v39  ;;  %v2293_v8 = vpop.xlane.xlu2 %593  ;;  %v731_v12 = vand.u32 2147483647, %v2238_v38  ;;  %1185 = vmatpush.msra.mxu1 %v1160_v33 }
 0x19f   : > { %v2246_v46 = vpop.eup %1646  ;;  %v696_v47 = vadd.f32 %v1639_v15, %v695_v21  ;;  %vm2308_vm15 = vcmp.eq.f32.partialorder %v761_v55, 8.507059e+37  ;;  %v1158_v21 = vld [vmem:[#allocation6 + $0x3d0] sm:$0xff]  ;;  %vm742_vm2 = vweird.f32 %v2230_v32  ;;  %vm2353_vm4 = vcmp.eq.f32.partialorder %v746_v7, 8.507059e+37  ;;  %v597_v55 = vpop.xlane.xlu0 %596 }
 0x1a0   : > { %v680_v50 = vmul.f32 %v1645_v35, %v679_v44  ;;  %v753_v51 = vmul.f32 %v2246_v46, %v2223_v19  ;;  %v1649_v56 = vpop.eup %1648  ;;  %v715_v11 = vsel %vm2276_vm11, %v2220_v16, %v2252_v31  ;;  %vm758_vm14 = vweird.f32 %v2246_v46  ;;  %1186 = vmatpush.msra.mxu1 %v1158_v21  ;;  %v1127_v44 = vld [vmem:[#allocation6 + $0x2d8] sm:$0xff]  ;;  %v1124_v31 = vld [vmem:[#allocation6 + $0x2c0] sm:$0xff] }
 0x1a1   : > { %v700_v52 = vsel %vm2259_vm8, %v1639_v15, %v696_v47  ;;  %v2312_v24 = vadd.f32 1.0, %v1649_v56  ;;  %vm2343_vm1 = vmor %vm757_vm12, %vm758_vm14  ;;  %v749_v53 = vor.u32 1.1754944e-38, %v748_v9  ;;  %v1157_v56 = vld [vmem:[#allocation6 + $0x3c8] sm:$0xff]  ;;  %v1553_v30 = vmul.f32 -1.442695, %v2314_v25  ;;  %v1119_v25 = vld [vmem:[#allocation6 + $0x298] sm:$0xff] }
 0x1a2   : > { %v681_v59 = vadd.f32 %v1645_v35, %v680_v50  ;;  %v2285_v62 = vpop.eup %1650  ;;  %v705_v63 = vsel %vm2234_vm3, %v704_v43, %v700_v52  ;;  %v754_v3 = vsub.f32 1.0, %v753_v51  ;;  %vm727_vm3 = vweird.f32 %v2238_v38  ;;  %1187 = vmatpush.msra.mxu1 %v1156_v48  ;;  %v1117_v48 = vld [vmem:[#allocation6 + $0x288] sm:$0xff] }
 0x1a3   : > { %v1653_v10 = vpop.eup %1652  ;;  %v738_v13 = vmul.f32 %v2285_v62, %v2230_v32  ;;  %v2317_v27 = vmul.f32 %v705_v63, %v2026_v5  ;;  %v2325_v36 = vmul.f32 %v705_v63, %v2029_v6  ;;  %1656 = vrcp.f32 %v2312_v24  ;;  %v1126_v6 = vld [vmem:[#allocation6 + $0x2d0] sm:$0xff] }
 0x1a4   : > { %v685_v57 = vsel %vm684_vm13, %v1645_v35, %v681_v59  ;;  %v2302_v22 = vpop.eup %1654  ;;  %v755_v23 = vmul.f32 %v2246_v46, %v754_v3  ;;  %v1129_v35 = vld [vmem:[#allocation6 + $0x2e8] sm:$0xff]  ;;  %vm743_vm0 = vweird.f32 %v2285_v62  ;;  %v2334_v41 = vadd.f32 1.0, %v1653_v10  ;;  %1166 = vmatpush.msra.mxu0 %v1126_v6  ;;  %v1122_v32 = vld [vmem:[#allocation6 + $0x2b0] sm:$0xff]  ;;  %v1123_v3 = vld [vmem:[#allocation6 + $0x2b8] sm:$0xff] }
 0x1a5   : > { %v690_v15 = vsel %vm2267_vm10, %v689_v54, %v685_v57  ;;  %v739_v29 = vsub.f32 1.0, %v738_v13  ;;  %v723_v20 = vmul.f32 %v2302_v22, %v2238_v38  ;;  %1205 = vmatpush.msra.mxu2 %v1129_v35  ;;  %v733_v43 = vand.u32 2147483648, %v2238_v38  ;;  %vm2367_vm6 = vmor %vm742_vm2, %vm743_vm0  ;;  %v1154_v63 = vld [vmem:[#allocation6 + $0x3b0] sm:$0xff]  ;;  %v1155_v57 = vld [vmem:[#allocation6 + $0x3b8] sm:$0xff] }
 0x1a6   : > { %v2320_v28 = vmul.f32 %v690_v15, %v2018_v2  ;;  %v2328_v37 = vmul.f32 %v690_v15, %v2023_v4  ;;  %v756_v5 = vadd.f32 %v2246_v46, %v755_v23  ;;  %v1161_v2 = vld [vmem:[#allocation6 + $0x3e8] sm:$0xff]  ;;  %v720_v4 = vsel %vm2254_vm7, %v2232_v34, %v715_v11  ;;  %1167 = vmatpush.msra.mxu0 %v1124_v31  ;;  %v2400_v11 = vpop.xlane.xlu2 %602  ;;  %v1118_v35 = vld [vmem:[#allocation6 + $0x290] sm:$0xff]  ;;  %v1148_v31 = vld [vmem:[#allocation6 + $0x380] sm:$0xff] }
 0x1a7   : > { %v740_v39 = vmul.f32 %v2285_v62, %v739_v29  ;;  %v724_v40 = vsub.f32 1.0, %v723_v20  ;;  %1225 = vmatpush.msra.mxu3 %v1161_v2  ;;  %vm728_vm5 = vweird.f32 %v2302_v22  ;;  %1206 = vmatpush.msra.mxu2 %v1127_v44  ;;  %v2375_v58 = vmul.f32 %v720_v4, %v2012_v0  ;;  %v1121_v15 = vld [vmem:[#allocation6 + $0x2a8] sm:$0xff]  ;;  %v1150_v6 = vld [vmem:[#allocation6 + $0x390] sm:$0xff]  ;;  %v1116_v44 = vld [vmem:[#allocation6 + $0x280] sm:$0xff] }
 0x1a8   : > { %v949_v34 = vadd.f32 %v2317_v27, %v2320_v28  ;;  %v970_v50 = vadd.f32 %v2325_v36, %v2328_v37  ;;  %v760_v51 = vsel %vm2343_vm1, %v2246_v46, %v756_v5  ;;  %v2378_v46 = vmul.f32 %v720_v4, %v2015_v1  ;;  %vm2394_vm8 = vmor %vm727_vm3, %vm728_vm5  ;;  %1168 = vmatpush.msra.mxu0 %v1122_v32  ;;  %v1700_v5 = vld [vmem:[%s2001_s12 + $0x30] sm:$0xff]  ;;  %v1115_v1 = vld [vmem:[#allocation6 + $0x278] sm:$0xff] }
 0x1a9   : > { %v741_v47 = vadd.f32 %v2285_v62, %v740_v39  ;;  %v725_v54 = vmul.f32 %v2302_v22, %v724_v40  ;;  %1226 = vmatpush.msra.mxu3 %v1159_v45  ;;  %vm2382_vm7 = vcmp.eq.f32.partialorder %v731_v12, 8.507059e+37  ;;  %1658 = vrcp.f32 %v2334_v41  ;;  %1207 = vmatpush.msra.mxu2 %v1125_v49  ;;  %v2387_v7 = vpop.eup %1656  ;;  %v1702_v45 = vld [vmem:[%s2001_s12 + $0x50] sm:$0xff]  ;;  %v1149_v49 = vld [vmem:[#allocation6 + $0x388] sm:$0xff] }
 0x1aa   : > { %v734_v9 = vor.u32 1.1754944e-38, %v733_v43  ;;  %vm802_vm9 = vweird.f32 %v2312_v24  ;;  %v806_v10 = vand.u32 2147483647, %v2312_v24  ;;  %v2405_v13 = vsel %vm2308_vm15, %v2281_v60, %v760_v51  ;;  %1188 = vmatpush.msra.mxu1 %v1154_v63  ;;  %1169 = vmatpush.msra.mxu0 %v1120_v17  ;;  %v1151_v43 = vld [vmem:[#allocation6 + $0x398] sm:$0xff]  ;;  %v1112_v17 = vld [vmem:[#allocation6 + $0x260] sm:$0xff] }
 0x1ab   : > { %v726_v0 = vadd.f32 %v2302_v22, %v725_v54  ;;  %1227 = vmatpush.msra.mxu3 %v1157_v56  ;;  %v745_v38 = vsel %vm2367_vm6, %v2285_v62, %v741_v47  ;;  %v798_v12 = vmul.f32 %v2387_v7, %v2312_v24  ;;  %v808_v14 = vand.u32 2147483648, %v2312_v24  ;;  %1208 = vmatpush.msra.mxu2 %v1123_v3  ;;  %v609_v62 = vpop.xlane.xlu1 %608  ;;  %v1146_v54 = vld [vmem:[#allocation6 + $0x370] sm:$0xff]  ;;  %v1703_v56 = vld [vmem:[%s2001_s12 + $0x40] sm:$0xff] }
 0x1ac   : > { %v950_v23 = vadd.f32 %v949_v34, %v2375_v58  ;;  %v971_v60 = vadd.f32 %v970_v50, %v2378_v46  ;;  %1660 = vpow2.f32 %v2283_v61  ;;  %v1552_v33 = vmul.f32 -1.442695, %v597_v55  ;;  %1189 = vmatpush.msra.mxu1 %v1152_v18  ;;  %v1701_v61 = vld [vmem:[%s2001_s12 + $0x38] sm:$0xff]  ;;  %1170 = vmatpush.msra.mxu0 %v1118_v35  ;;  %v1144_v18 = vld [vmem:[#allocation6 + $0x360] sm:$0xff]  ;;  %v1110_v24 = vld [vmem:[#allocation6 + $0x250] sm:$0xff] }
 0x1ad   : > { %v730_v16 = vsel %vm2394_vm8, %v2302_v22, %v726_v0  ;;  %1228 = vmatpush.msra.mxu3 %v1155_v57  ;;  %v799_v20 = vsub.f32 1.0, %v798_v12  ;;  %1209 = vmatpush.msra.mxu2 %v1121_v15  ;;  %v750_v22 = vsel %vm2353_vm4, %v749_v53, %v745_v38  ;;  %v1551_v40 = vmul.f32 -1.442695, %v2293_v8  ;;  %v1114_v53 = vld [vmem:[#allocation6 + $0x270] sm:$0xff]  ;;  %v606_v0 = vpop.xlane.xlu0 %605  ;;  %v1113_v15 = vld [vmem:[#allocation6 + $0x268] sm:$0xff] }
 0x1ae   : > { %v735_v29 = vsel %vm2382_vm7, %v734_v9, %v730_v16  ;;  %vm803_vm10 = vweird.f32 %v2387_v7  ;;  %1662 = vpow2.f32 %v1553_v30  ;;  %v1556_v42 = vmul.f32 -1.442695, %v609_v62  ;;  %1190 = vmatpush.msra.mxu1 %v1150_v6  ;;  %1171 = vmatpush.msra.mxu0 %v1116_v44  ;;  %v1147_v9 = vld [vmem:[#allocation6 + $0x378] sm:$0xff]  ;;  %v1108_v44 = vld [vmem:[#allocation6 + $0x240] sm:$0xff] }
 0x1af   : > { %v2425_v2 = vmul.f32 %v1700_v5, %v735_v29  ;;  %v2428_v39 = vmul.f32 %v1701_v61, %v735_v29  ;;  %1229 = vmatpush.msra.mxu3 %v1153_v26  ;;  %v2431_v21 = vpop.eup %1658  ;;  %v800_v4 = vmul.f32 %v2387_v7, %v799_v20  ;;  %1210 = vmatpush.msra.mxu2 %v1119_v25  ;;  %v791_v19 = vand.u32 2147483647, %v2334_v41  ;;  %vm2456_vm12 = vmor %vm802_vm9, %vm803_vm10  ;;  %v1145_v26 = vld [vmem:[#allocation6 + $0x368] sm:$0xff]  ;;  %v1705_v25 = vld [vmem:[%s2001_s12 + $0x58] sm:$0xff] }
 0x1b0   : > { %v2437_v34 = vmul.f32 %v1702_v45, %v2405_v13  ;;  %v783_v47 = vmul.f32 %v2431_v21, %v2334_v41  ;;  %vm2445_vm11 = vcmp.eq.f32.partialorder %v806_v10, 8.507059e+37  ;;  %1664 = vpow2.f32 %v1552_v33  ;;  %1191 = vmatpush.msra.mxu1 %v1148_v31  ;;  %1172 = vmatpush.msra.mxu0 %v1114_v53  ;;  %v1704_v10 = vld [vmem:[%s2001_s12 + $0x48] sm:$0xff]  ;;  %v1111_v33 = vld [vmem:[#allocation6 + $0x258] sm:$0xff]  ;;  %v1140_v45 = vld [vmem:[#allocation6 + $0x340] sm:$0xff] }
 0x1b1   : > { %v951_v8 = vadd.f32 %v950_v23, %v2425_v2  ;;  %1230 = vmatpush.msra.mxu3 %v1151_v43  ;;  %v972_v50 = vadd.f32 %v971_v60, %v2428_v39  ;;  %v801_v51 = vadd.f32 %v2387_v7, %v800_v4  ;;  %1211 = vmatpush.msra.mxu2 %v1117_v48  ;;  %v793_v3 = vand.u32 2147483648, %v2334_v41  ;;  %v1103_v62 = vld [vmem:[#allocation6 + $0x218] sm:$0xff] }
 0x1b2   : > { %v1661_v55 = vpop.eup %1660  ;;  %v2450_v59 = vmul.f32 %v1703_v56, %v750_v22  ;;  %v784_v63 = vsub.f32 1.0, %v783_v47  ;;  %1666 = vpow2.f32 %v1551_v40  ;;  %v2462_v57 = vmul.f32 %v1704_v10, %v750_v22  ;;  %1192 = vmatpush.msra.mxu1 %v1146_v54  ;;  %1173 = vmatpush.msra.mxu0 %v1112_v17  ;;  %v1143_v40 = vld [vmem:[#allocation6 + $0x358] sm:$0xff]  ;;  %v1106_v54 = vld [vmem:[#allocation6 + $0x230] sm:$0xff]  ;;  %v1136_v17 = vld [vmem:[#allocation6 + $0x320] sm:$0xff] }
 0x1b3   : > { %1231 = vmatpush.msra.mxu3 %v1149_v49  ;;  %v805_v38 = vsel %vm2456_vm12, %v2387_v7, %v801_v51  ;;  %v2467_v12 = vadd.f32 1.0, %v1661_v55  ;;  %1668 = vpow2.f32 %v1556_v42  ;;  %1212 = vmatpush.msra.mxu2 %v1115_v1  ;;  %v809_v60 = vor.u32 1.1754944e-38, %v808_v14  ;;  %v612_v7 = vpop.xlane.xlu2 %611  ;;  %v1142_v14 = vld [vmem:[#allocation6 + $0x350] sm:$0xff]  ;;  %v1706_v49 = vld [vmem:[%s2001_s12 + $0x80] sm:$0xff]  ;;  %v1107_v56 = vld [vmem:[#allocation6 + $0x238] sm:$0xff] }
 0x1b4   : > { %v952_v23 = vadd.f32 %v951_v8, %v2450_v59  ;;  %v785_v16 = vmul.f32 %v2431_v21, %v784_v63  ;;  %vm2473_vm13 = vcmp.eq.f32.partialorder %v791_v19, 8.507059e+37  ;;  %v1663_v29 = vpop.eup %1662  ;;  %v973_v20 = vadd.f32 %v972_v50, %v2462_v57  ;;  %1193 = vmatpush.msra.mxu1 %v1144_v18  ;;  %1174 = vmatpush.msra.mxu0 %v1110_v24  ;;  %v1109_v8 = vld [vmem:[#allocation6 + $0x248] sm:$0xff]  ;;  %v1138_v55 = vld [vmem:[#allocation6 + $0x330] sm:$0xff] }
 0x1b5   : > { %1232 = vmatpush.msra.mxu3 %v1147_v9  ;;  %vm788_vm14 = vweird.f32 %v2431_v21  ;;  %1670 = vrcp.f32 %v2467_v12  ;;  %v1555_v30 = vmul.f32 -1.442695, %v606_v0  ;;  %v810_v35 = vsel %vm2445_vm11, %v809_v60, %v805_v38  ;;  %1213 = vmatpush.msra.mxu2 %v1113_v15  ;;  %v1707_v1 = vld [vmem:[%s2001_s12 + $0x88] sm:$0xff]  ;;  %v1104_v38 = vld [vmem:[#allocation6 + $0x220] sm:$0xff] }
 0x1b6   : > { %v786_v22 = vadd.f32 %v2431_v21, %v785_v16  ;;  %v2483_v5 = vadd.f32 1.0, %v1663_v29  ;;  %v1554_v61 = vmul.f32 -1.442695, %v2400_v11  ;;  %v1665_v6 = vpop.eup %1664  ;;  %v2488_v4 = vmul.f32 %v1705_v25, %v2405_v13  ;;  %1194 = vmatpush.msra.mxu1 %v1142_v14  ;;  %1175 = vmatpush.msra.mxu0 %v1108_v44  ;;  %v1105_v18 = vld [vmem:[#allocation6 + $0x228] sm:$0xff]  ;;  %v1102_v16 = vld [vmem:[#allocation6 + $0x210] sm:$0xff] }
 0x1b7   : > { %1233 = vmatpush.msra.mxu3 %v1145_v26  ;;  %vm787_vm15 = vweird.f32 %v2334_v41  ;;  %v794_v42 = vor.u32 1.1754944e-38, %v793_v3  ;;  %v2491_v43 = vmul.f32 -1.442695, %v612_v7  ;;  %v2500_v13 = vadd.f32 %v952_v23, %v2437_v34  ;;  %1214 = vmatpush.msra.mxu2 %v1111_v33  ;;  %v1141_v41 = vld [vmem:[#allocation6 + $0x348] sm:$0xff]  ;;  %v1134_v7 = vld [vmem:[#allocation6 + $0x310] sm:$0xff] }
 0x1b8   : > { %v1667_v11 = vpop.eup %1666  ;;  %vm2495_vm0 = vmor %vm787_vm15, %vm788_vm14  ;;  %1672 = vrcp.f32 %v2483_v5  ;;  %v993_v19 = vmax.f32 %v2320_v28, %v2375_v58  ;;  %v994_v31 = vmax.f32 %v2317_v27, %v2425_v2  ;;  %v2508_v50 = vmul.f32 %v1706_v49, %v810_v35  ;;  %1195 = vmatpush.msra.mxu1 %v1140_v45  ;;  %1176 = vmatpush.msra.mxu0 %v1106_v54  ;;  %v1137_v60 = vld [vmem:[#allocation6 + $0x328] sm:$0xff]  ;;  %v1065_v49 = vld [vmem:[#allocation6 + $0xf0] sm:$0xff] }
 0x1b9   : > { %1234 = vmatpush.msra.mxu3 %v1143_v40  ;;  %v1669_v48 = vpop.eup %1668  ;;  %v790_v51 = vsel %vm2495_vm0, %v2431_v21, %v786_v22  ;;  %v2514_v52 = vadd.f32 %v973_v20, %v2488_v4  ;;  %v776_v53 = vand.u32 2147483647, %v2467_v12  ;;  %v778_v32 = vand.u32 2147483648, %v2467_v12  ;;  %1215 = vmatpush.msra.mxu2 %v1109_v8  ;;  %v1139_v21 = vld [vmem:[#allocation6 + $0x338] sm:$0xff]  ;;  %v1132_v40 = vld [vmem:[#allocation6 + $0x300] sm:$0xff]  ;;  %v1101_v8 = vld [vmem:[#allocation6 + $0x208] sm:$0xff] }
 0x1ba   : > { %v2518_v63 = vadd.f32 1.0, %v1665_v6  ;;  %v2520_v3 = vadd.f32 1.0, %v1667_v11  ;;  %1674 = vpow2.f32 %v1555_v30  ;;  %v2525_v9 = vmul.f32 %v1707_v1, %v810_v35  ;;  %1196 = vmatpush.msra.mxu1 %v1138_v55  ;;  %1177 = vmatpush.msra.mxu0 %v1104_v38  ;;  %v1135_v20 = vld [vmem:[#allocation6 + $0x318] sm:$0xff]  ;;  %v1708_v6 = vld [vmem:[%s2001_s12 + $0x70] sm:$0xff]  ;;  %v1133_v11 = vld [vmem:[#allocation6 + $0x308] sm:$0xff] }
 0x1bb   : > { %1235 = vmatpush.msra.mxu3 %v1141_v41  ;;  %v2522_v0 = vpop.eup %1670  ;;  %vm772_vm1 = vweird.f32 %v2467_v12  ;;  %v2528_v10 = vadd.f32 1.0, %v1669_v48  ;;  %1676 = vpow2.f32 %v1554_v61  ;;  %v795_v15 = vsel %vm2473_vm13, %v794_v42, %v790_v51  ;;  %1216 = vmatpush.msra.mxu2 %v1107_v56  ;;  %v1100_v61 = vld [vmem:[#allocation6 + $0x200] sm:$0xff]  ;;  %v1709_v41 = vld [vmem:[%s2001_s12 + $0x78] sm:$0xff]  ;;  %v1097_v51 = vld [vmem:[#allocation6 + $0x1f0] sm:$0xff] }
 0x1bc   : > { %v768_v23 = vmul.f32 %v2522_v0, %v2467_v12  ;;  %1678 = vrcp.f32 %v2518_v63  ;;  %v2536_v26 = vmax.f32 %v993_v19, %v2450_v59  ;;  %v853_v29 = vand.u32 2147483648, %v2483_v5  ;;  %1197 = vmatpush.msra.mxu1 %v1136_v17  ;;  %1178 = vmatpush.msra.mxu0 %v1102_v16 }
 0x1bd   : > { %1236 = vmatpush.msra.mxu3 %v1139_v21  ;;  %1680 = vrcp.f32 %v2520_v3  ;;  %v2541_v30 = vmax.f32 %v994_v31, %v2437_v34  ;;  %v1014_v24 = vmax.f32 %v2328_v37, %v2378_v46  ;;  %vm2547_vm2 = vcmp.eq.f32.partialorder %v776_v53, 8.507059e+37  ;;  %1217 = vmatpush.msra.mxu2 %v1105_v18  ;;  %v1098_v21 = vld [vmem:[#allocation6 + $0x1f8] sm:$0xff]  ;;  %v1063_v18 = vld [vmem:[#allocation6 + $0xe0] sm:$0xff] }
 0x1be   : > { %v2545_v14 = vpop.eup %1672  ;;  %v769_v33 = vsub.f32 1.0, %v768_v23  ;;  %v2551_v22 = vor.u32 1.1754944e-38, %v778_v32  ;;  %1682 = vrcp.f32 %v2528_v10  ;;  %v2555_v25 = vmul.f32 %v1708_v6, %v795_v15  ;;  %1198 = vmatpush.msra.mxu1 %v1134_v7  ;;  %1179 = vmatpush.msra.mxu0 %v1100_v61  ;;  %v1066_v32 = vld [vmem:[#allocation6 + $0xf8] sm:$0xff] }
 0x1bf   : > { %1237 = vmatpush.msra.mxu3 %v1137_v60  ;;  %v843_v42 = vmul.f32 %v2545_v14, %v2483_v5  ;;  %vm847_vm3 = vweird.f32 %v2483_v5  ;;  %v851_v44 = vand.u32 2147483647, %v2483_v5  ;;  %v838_v45 = vand.u32 2147483648, %v2518_v63  ;;  %1218 = vmatpush.msra.mxu2 %v1103_v62 }
 0x1c0   : > { %v1675_v47 = vpop.eup %1674  ;;  %v2563_v19 = vmul.f32 %v1709_v41, %v795_v15  ;;  %v770_v31 = vmul.f32 %v2522_v0, %v769_v33  ;;  %vm773_vm4 = vweird.f32 %v2522_v0  ;;  %v821_v48 = vand.u32 2147483647, %v2520_v3  ;;  %1199 = vmatpush.msra.mxu1 %v1132_v40  ;;  %v1095_v15 = vld [vmem:[#allocation6 + $0x1e0] sm:$0xff]  ;;  %1244 = vmatpush.msrb.mxu0 %v1065_v49  ;;  %v1096_v33 = vld [vmem:[#allocation6 + $0x1e8] sm:$0xff]  ;;  %v1086_v40 = vld [vmem:[#allocation6 + $0x198] sm:$0xff] }
 0x1c1   : > { %1238 = vmatpush.msra.mxu3 %v1135_v20  ;;  %v1677_v53 = vpop.eup %1676  ;;  %v844_v54 = vsub.f32 1.0, %v843_v42  ;;  %v2568_v55 = vor.u32 1.1754944e-38, %v853_v29  ;;  %vm832_vm5 = vweird.f32 %v2518_v63  ;;  %v836_v56 = vand.u32 2147483647, %v2518_v63  ;;  %1219 = vmatpush.msra.mxu2 %v1101_v8  ;;  %vm2584_vm8 = vmor %vm772_vm1, %vm773_vm4  ;;  %v1064_v20 = vld [vmem:[#allocation6 + $0xe8] sm:$0xff]  ;;  %v1051_v42 = vld [vmem:[#allocation6 + $0x80] sm:$0xff] }
 0x1c2   : > { %v2572_v1 = vpop.eup %1678  ;;  %v771_v38 = vadd.f32 %v2522_v0, %v770_v31  ;;  %vm848_vm6 = vweird.f32 %v2545_v14  ;;  %vm817_vm7 = vweird.f32 %v2520_v3  ;;  %v823_v17 = vand.u32 2147483648, %v2520_v3  ;;  %1264 = vmatpush.msrb.mxu1 %v1097_v51  ;;  %1245 = vmatpush.msrb.mxu0 %v1063_v18  ;;  %v1062_v31 = vld [vmem:[#allocation6 + $0xd8] sm:$0xff]  ;;  %v1711_v49 = vld [vmem:[%s2001_s12 + $0x68] sm:$0xff] }
 0x1c3   : > { %1239 = vmatpush.msra.mxu3 %v1133_v11  ;;  %v2578_v23 = vpop.eup %1680  ;;  %v845_v16 = vmul.f32 %v2545_v14, %v844_v54  ;;  %v828_v7 = vmul.f32 %v2572_v1, %v2518_v63  ;;  %v2591_v29 = vor.u32 1.1754944e-38, %v838_v45  ;;  %v2593_v62 = vadd.f32 1.0, %v1675_v47  ;;  %1284 = vmatpush.msrb.mxu2 %v1066_v32  ;;  %v1094_v32 = vld [vmem:[#allocation6 + $0x1d8] sm:$0xff]  ;;  %vm2639_vm13 = vmor %vm847_vm3, %vm848_vm6  ;;  %v1083_v54 = vld [vmem:[#allocation6 + $0x180] sm:$0xff] }
 0x1c4   : > { %v2595_v61 = vpop.eup %1682  ;;  %v775_v12 = vsel %vm2584_vm8, %v2522_v0, %v771_v38  ;;  %vm2600_vm9 = vcmp.eq.f32.partialorder %v851_v44, 8.507059e+37  ;;  %v813_v6 = vmul.f32 %v2578_v23, %v2520_v3  ;;  %vm2606_vm10 = vcmp.eq.f32.partialorder %v821_v48, 8.507059e+37  ;;  %v1061_v0 = vld [vmem:[#allocation6 + $0xd0] sm:$0xff]  ;;  %1265 = vmatpush.msrb.mxu1 %v1095_v15  ;;  %v1710_v48 = vld [vmem:[%s2001_s12 + $0x60] sm:$0xff]  ;;  %v1060_v15 = vld [vmem:[#allocation6 + $0xc8] sm:$0xff] }
 0x1c5   : > { %v896_v45 = vand.u32 2147483647, %v2528_v10  ;;  %1684 = vpow2.f32 %v2491_v43  ;;  %1304 = vmatpush.msrb.mxu3 %v1098_v21  ;;  %v1093_v44 = vld [vmem:[#allocation6 + $0x1d0] sm:$0xff]  ;;  %v780_v8 = vsel %vm2547_vm2, %v2551_v22, %v775_v12  ;;  %v2616_v11 = vadd.f32 %v2545_v14, %v845_v16  ;;  %1285 = vmatpush.msrb.mxu2 %v1064_v20  ;;  %v1059_v21 = vld [vmem:[#allocation6 + $0xc0] sm:$0xff] }
 0x1c6   : > { %v829_v47 = vsub.f32 1.0, %v828_v7  ;;  %v888_v41 = vmul.f32 %v2595_v61, %v2528_v10  ;;  %v2621_v43 = vmul.f32 %v1710_v48, %v780_v8  ;;  %v2624_v51 = vmul.f32 %v1711_v49, %v780_v8  ;;  %1246 = vmatpush.msrb.mxu0 %v1061_v0  ;;  %1266 = vmatpush.msrb.mxu1 %v1093_v44  ;;  %v1092_v7 = vld [vmem:[#allocation6 + $0x1c8] sm:$0xff]  ;;  %v1057_v20 = vld [vmem:[#allocation6 + $0xb0] sm:$0xff]  ;;  %v1058_v44 = vld [vmem:[#allocation6 + $0xb8] sm:$0xff] }
 0x1c7   : > { %vm2626_vm11 = vcmp.eq.f32.partialorder %v836_v56, 8.507059e+37  ;;  %v814_v35 = vsub.f32 1.0, %v813_v6  ;;  %v2630_v22 = vadd.f32 1.0, %v1677_v53  ;;  %1305 = vmatpush.msrb.mxu3 %v1096_v33  ;;  %vm833_vm12 = vweird.f32 %v2572_v1  ;;  %v1091_v56 = vld [vmem:[#allocation6 + $0x1c0] sm:$0xff]  ;;  %1286 = vmatpush.msrb.mxu2 %v1062_v31  ;;  %v1090_v31 = vld [vmem:[#allocation6 + $0x1b8] sm:$0xff] }
 0x1c8   : > { %v830_v38 = vmul.f32 %v2572_v1, %v829_v47  ;;  %v889_v18 = vsub.f32 1.0, %v888_v41  ;;  %1686 = vrcp.f32 %v2593_v62  ;;  %vm818_vm14 = vweird.f32 %v2578_v23  ;;  %1247 = vmatpush.msrb.mxu0 %v1059_v21  ;;  %vm2662_vm15 = vmor %vm832_vm5, %vm833_vm12  ;;  %1267 = vmatpush.msrb.mxu1 %v1091_v56  ;;  %v1055_v48 = vld [vmem:[#allocation6 + $0xa0] sm:$0xff] }
 0x1c9   : > { %v815_v60 = vmul.f32 %v2578_v23, %v814_v35  ;;  %v824_v16 = vor.u32 1.1754944e-38, %v823_v17  ;;  %v998_v33 = vmax.f32 %v2541_v30, %v2555_v25  ;;  %v850_v5 = vsel %vm2639_vm13, %v2545_v14, %v2616_v11  ;;  %1306 = vmatpush.msrb.mxu3 %v1094_v32  ;;  %v1089_v17 = vld [vmem:[#allocation6 + $0x1b0] sm:$0xff]  ;;  %1287 = vmatpush.msrb.mxu2 %v1060_v15  ;;  %vm2672_vm1 = vmor %vm817_vm7, %vm818_vm14  ;;  %v1087_v49 = vld [vmem:[#allocation6 + $0x1a0] sm:$0xff] }
 0x1ca   : > { %v831_v12 = vadd.f32 %v2572_v1, %v830_v38  ;;  %v890_v6 = vmul.f32 %v2595_v61, %v889_v18  ;;  %v898_v0 = vand.u32 2147483648, %v2528_v10  ;;  %v954_v47 = vadd.f32 %v2500_v13, %v2621_v43  ;;  %1248 = vmatpush.msrb.mxu0 %v1057_v20  ;;  %v1056_v35 = vld [vmem:[#allocation6 + $0xa8] sm:$0xff]  ;;  %1268 = vmatpush.msrb.mxu1 %v1089_v17  ;;  %v1053_v18 = vld [vmem:[#allocation6 + $0x90] sm:$0xff] }
 0x1cb   : > { %v1685_v8 = vpop.eup %1684  ;;  %v975_v41 = vadd.f32 %v2514_v52, %v2624_v51  ;;  %v816_v11 = vadd.f32 %v2578_v23, %v815_v60  ;;  %vm892_vm0 = vweird.f32 %v2528_v10  ;;  %vm893_vm2 = vweird.f32 %v2595_v61  ;;  %1307 = vmatpush.msrb.mxu3 %v1092_v7  ;;  %1288 = vmatpush.msrb.mxu2 %v1058_v44  ;;  %v1088_v38 = vld [vmem:[#allocation6 + $0x1a8] sm:$0xff]  ;;  %v1085_v60 = vld [vmem:[#allocation6 + $0x190] sm:$0xff]  ;;  %v1054_v7 = vld [vmem:[#allocation6 + $0x98] sm:$0xff] }
 0x1cc   : > { %vm2677_vm3 = vcmp.eq.f32.partialorder %v896_v45, 8.507059e+37  ;;  %v881_v63 = vand.u32 2147483647, %v2593_v62  ;;  %1688 = vrcp.f32 %v2630_v22  ;;  %v835_v3 = vsel %vm2662_vm15, %v2572_v1, %v831_v12  ;;  %1249 = vmatpush.msrb.mxu0 %v1055_v48  ;;  %1269 = vmatpush.msrb.mxu1 %v1087_v49  ;;  %vm2721_vm5 = vmor %vm892_vm0, %vm893_vm2  ;;  %v1084_v10 = vld [vmem:[#allocation6 + $0x188] sm:$0xff]  ;;  %v1050_v49 = vld [vmem:[#allocation6 + $0x78] sm:$0xff] }
 0x1cd   : > { %v820_v32 = vsel %vm2672_vm1, %v2578_v23, %v816_v11  ;;  %v891_v45 = vadd.f32 %v2595_v61, %v890_v6  ;;  %v883_v21 = vand.u32 2147483648, %v2593_v62  ;;  %v2696_v15 = vsel %vm2600_vm9, %v2568_v55, %v850_v5  ;;  %1308 = vmatpush.msrb.mxu3 %v1090_v31  ;;  %1289 = vmatpush.msrb.mxu2 %v1056_v35  ;;  %v1712_v5 = vld [vmem:[%s2001_s12 + $0x90] sm:$0xff]  ;;  %v1713_v31 = vld [vmem:[%s2001_s12 + $0x98] sm:$0xff]  ;;  %v1079_v52 = vld [vmem:[#allocation6 + $0x160] sm:$0xff] }
 0x1ce   : > { %v2691_v56 = vpop.eup %1686  ;;  %v825_v1 = vsel %vm2606_vm10, %v824_v16, %v820_v32  ;;  %v899_v23 = vor.u32 1.1754944e-38, %v898_v0  ;;  %v2700_v53 = vadd.f32 1.0, %v1685_v8  ;;  %v2703_v20 = vadd.f32 %v954_v47, %v2555_v25  ;;  %1250 = vmatpush.msrb.mxu0 %v1053_v18  ;;  %1270 = vmatpush.msrb.mxu1 %v1085_v60  ;;  %v1082_v32 = vld [vmem:[#allocation6 + $0x178] sm:$0xff]  ;;  %v1045_v0 = vld [vmem:[#allocation6 + $0x50] sm:$0xff]  ;;  %v1072_v18 = vld [vmem:[#allocation6 + $0x128] sm:$0xff] }
 0x1cf   : > { %v2706_v12 = vadd.f32 %v975_v41, %v2563_v19  ;;  %v873_v55 = vmul.f32 %v2691_v56, %v2593_v62  ;;  %vm877_vm4 = vweird.f32 %v2593_v62  ;;  %v840_v16 = vsel %vm2626_vm11, %v2591_v29, %v835_v3  ;;  %1309 = vmatpush.msrb.mxu3 %v1088_v38  ;;  %v1052_v29 = vld [vmem:[#allocation6 + $0x88] sm:$0xff]  ;;  %1290 = vmatpush.msrb.mxu2 %v1054_v7  ;;  %v1049_v41 = vld [vmem:[#allocation6 + $0x70] sm:$0xff] }
 0x1d0   : > { %v2715_v6 = vmul.f32 %v1712_v5, %v825_v1  ;;  %v866_v17 = vand.u32 2147483647, %v2630_v22  ;;  %1690 = vrcp.f32 %v2700_v53  ;;  %vm2727_vm6 = vcmp.eq.f32.partialorder %v881_v63, 8.507059e+37  ;;  %1251 = vmatpush.msrb.mxu0 %v1051_v42  ;;  %v1081_v63 = vld [vmem:[#allocation6 + $0x170] sm:$0xff]  ;;  %1271 = vmatpush.msrb.mxu1 %v1083_v54  ;;  %v1080_v5 = vld [vmem:[#allocation6 + $0x168] sm:$0xff] }
 0x1d1   : > { %v874_v44 = vsub.f32 1.0, %v873_v55  ;;  %v2731_v47 = vor.u32 1.1754944e-38, %v883_v21  ;;  %v895_v14 = vsel %vm2721_vm5, %v2595_v61, %v891_v45  ;;  %v2739_v48 = vmul.f32 %v1713_v31, %v825_v1  ;;  %1310 = vmatpush.msrb.mxu3 %v1086_v40  ;;  %1291 = vmatpush.msrb.mxu2 %v1052_v29  ;;  %v1047_v45 = vld [vmem:[#allocation6 + $0x60] sm:$0xff]  ;;  %v1048_v1 = vld [vmem:[#allocation6 + $0x68] sm:$0xff]  ;;  %v1718_v31 = vld [vmem:[%s2001_s12 + $0xb8] sm:$0xff] }
 0x1d2   : > { %v2736_v11 = vpop.eup %1688  ;;  %vm862_vm7 = vweird.f32 %v2630_v22  ;;  %v868_v13 = vand.u32 2147483648, %v2630_v22  ;;  %v900_v35 = vsel %vm2677_vm3, %v899_v23, %v895_v14  ;;  %vm878_vm8 = vweird.f32 %v2691_v56  ;;  %v1714_v21 = vld [vmem:[%s2001_s12 + $0xa0] sm:$0xff]  ;;  %1252 = vmatpush.msrb.mxu0 %v1049_v41  ;;  %v1715_v23 = vld [vmem:[%s2001_s12 + $0xb0] sm:$0xff]  ;;  %1272 = vmatpush.msrb.mxu1 %v1081_v63  ;;  %v1717_v29 = vld [vmem:[%s2001_s12 + $0xa8] sm:$0xff] }
 0x1d3   : > { %v875_v61 = vmul.f32 %v2691_v56, %v874_v44  ;;  %v858_v3 = vmul.f32 %v2736_v11, %v2630_v22  ;;  %v2750_v38 = vmul.f32 %v1714_v21, %v840_v16  ;;  %vm2752_vm9 = vcmp.eq.f32.partialorder %v866_v17, 8.507059e+37  ;;  %1311 = vmatpush.msrb.mxu3 %v1084_v10  ;;  %1292 = vmatpush.msrb.mxu2 %v1050_v49  ;;  %v1716_v17 = vld [vmem:[%s2001_s12 + $0xe0] sm:$0xff]  ;;  %vm2781_vm10 = vmor %vm877_vm4, %vm878_vm8  ;;  %v1077_v10 = vld [vmem:[#allocation6 + $0x150] sm:$0xff] }
 0x1d4   : > { %v2758_v60 = vmul.f32 %v1715_v23, %v2696_v15  ;;  %v997_v7 = vmax.f32 %v2536_v26, %v2621_v43  ;;  %v2766_v55 = vmax.f32 %v998_v33, %v2715_v6  ;;  %v2770_v54 = vmul.f32 %v1716_v17, %v900_v35  ;;  %1253 = vmatpush.msrb.mxu0 %v1047_v45  ;;  %v1046_v41 = vld [vmem:[#allocation6 + $0x58] sm:$0xff]  ;;  %v1044_v45 = vld [vmem:[#allocation6 + $0x48] sm:$0xff] }
 0x1d5   : > { %v876_v40 = vadd.f32 %v2691_v56, %v875_v61  ;;  %v859_v42 = vsub.f32 1.0, %v858_v3  ;;  %v2773_v44 = vmul.f32 %v1717_v29, %v840_v16  ;;  %v869_v33 = vor.u32 1.1754944e-38, %v868_v13  ;;  %1312 = vmatpush.msrb.mxu3 %v1082_v32  ;;  %1273 = vmatpush.msrb.mxu1 %v1079_v52  ;;  %v1078_v61 = vld [vmem:[#allocation6 + $0x158] sm:$0xff]  ;;  %v1043_v3 = vld [vmem:[#allocation6 + $0x40] sm:$0xff]  ;;  %v1719_v21 = vld [vmem:[%s2001_s12 + $0xe8] sm:$0xff] }
 0x1d6   : > { %v2775_v26 = vpop.eup %1690  ;;  %v2786_v14 = vmax.f32 %v997_v7, %v2508_v50  ;;  %v1002_v16 = vmax.f32 %v2766_v55, %v2758_v60  ;;  %v2792_v63 = vmul.f32 %v1718_v31, %v2696_v15  ;;  %vm863_vm11 = vweird.f32 %v2736_v11  ;;  %1293 = vmatpush.msrb.mxu2 %v1048_v1  ;;  %1254 = vmatpush.msrb.mxu0 %v1045_v0  ;;  %v1075_v15 = vld [vmem:[#allocation6 + $0x140] sm:$0xff]  ;;  %v1721_v17 = vld [vmem:[%s2001_s12 + $0xd8] sm:$0xff]  ;;  %v1068_v55 = vld [vmem:[#allocation6 + $0x108] sm:$0xff] }
 0x1d7   : > { %v880_v62 = vsel %vm2781_vm10, %v2691_v56, %v876_v40  ;;  %v860_v13 = vmul.f32 %v2736_v11, %v859_v42  ;;  %v903_v49 = vmul.f32 %v2775_v26, %v2700_v53  ;;  %v911_v32 = vand.u32 2147483647, %v2700_v53  ;;  %1313 = vmatpush.msrb.mxu3 %v1080_v5  ;;  %1274 = vmatpush.msrb.mxu1 %v1077_v10  ;;  %v1076_v40 = vld [vmem:[#allocation6 + $0x148] sm:$0xff]  ;;  %v1720_v42 = vld [vmem:[%s2001_s12 + $0xd0] sm:$0xff]  ;;  %vm2820_vm12 = vmor %vm862_vm7, %vm863_vm11 }
 0x1d8   : > { %v885_v56 = vsel %vm2727_vm6, %v2731_v47, %v880_v62  ;;  %v2806_v23 = vmul.f32 %v1719_v21, %v900_v35  ;;  %v1015_v52 = vmax.f32 %v2325_v36, %v2428_v39  ;;  %1294 = vmatpush.msrb.mxu2 %v1046_v41  ;;  %v1001_v8 = vmax.f32 %v2786_v14, %v2750_v38  ;;  %v1041_v47 = vld [vmem:[#allocation6 + $0x30] sm:$0xff]  ;;  %v1042_v22 = vld [vmem:[#allocation6 + $0x38] sm:$0xff] }
 0x1d9   : > { %v861_v1 = vadd.f32 %v2736_v11, %v860_v13  ;;  %v904_v7 = vsub.f32 1.0, %v903_v49  ;;  %v2812_v5 = vmul.f32 %v1720_v42, %v885_v56  ;;  %v913_v0 = vand.u32 2147483648, %v2700_v53  ;;  %1314 = vmatpush.msrb.mxu3 %v1078_v61  ;;  %1255 = vmatpush.msrb.mxu0 %v1043_v3  ;;  %v1073_v41 = vld [vmem:[#allocation6 + $0x130] sm:$0xff]  ;;  %v1074_v62 = vld [vmem:[#allocation6 + $0x138] sm:$0xff]  ;;  %v1039_v13 = vld [vmem:[#allocation6 + $0x20] sm:$0xff] }
 0x1da   : > { %v2826_v29 = vmul.f32 %v1721_v17, %v885_v56  ;;  %v1016_v30 = vmax.f32 %v1014_v24, %v2462_v57  ;;  %v1017_v10 = vmax.f32 %v1015_v52, %v2488_v4  ;;  %vm908_vm13 = vweird.f32 %v2775_v26  ;;  %1275 = vmatpush.msrb.mxu1 %v1075_v15  ;;  %1295 = vmatpush.msrb.mxu2 %v1044_v45  ;;  %v1071_v3 = vld [vmem:[#allocation6 + $0x120] sm:$0xff]  ;;  %v1040_v56 = vld [vmem:[#allocation6 + $0x28] sm:$0xff]  ;;  %v1069_v42 = vld [vmem:[#allocation6 + $0x110] sm:$0xff] }
 0x1db   : > { %v865_v14 = vsel %vm2820_vm12, %v2736_v11, %v861_v1  ;;  %v905_v31 = vmul.f32 %v2775_v26, %v904_v7  ;;  %v956_v24 = vadd.f32 %v2703_v20, %v2508_v50  ;;  %1315 = vmatpush.msrb.mxu3 %v1076_v40  ;;  %1256 = vmatpush.msrb.mxu0 %v1041_v47  ;;  %vm907_vm14 = vweird.f32 %v2700_v53  ;;  %v1722_v45 = vld [vmem:[%s2001_s12 + $0xc0] sm:$0xff]  ;;  %v1723_v52 = vld [vmem:[%s2001_s12 + $0xc8] sm:$0xff]  ;;  %v1038_v47 = vld [vmem:[#allocation6 + $0x18] sm:$0xff] }
 0x1dc   : > { %v870_v49 = vsel %vm2752_vm9, %v869_v33, %v865_v14  ;;  %v1018_v61 = vmax.f32 %v1016_v30, %v2624_v51  ;;  %v1019_v11 = vmax.f32 %v1017_v10, %v2563_v19  ;;  %1276 = vmatpush.msrb.mxu1 %v1073_v41  ;;  %1296 = vmatpush.msrb.mxu2 %v1042_v22  ;;  %v1037_v33 = vld [vmem:[#allocation6 + $0x10] sm:$0xff]  ;;  %vm2854_vm15 = vmor %vm907_vm14, %vm908_vm13  ;;  %v914_v7 = vor.u32 1.1754944e-38, %v913_v0  ;;  %v1070_v10 = vld [vmem:[#allocation6 + $0x118] sm:$0xff] }
 0x1dd   : > { %v906_v15 = vadd.f32 %v2775_v26, %v905_v31  ;;  %v2847_v21 = vmul.f32 %v1722_v45, %v870_v49  ;;  %v2850_v20 = vmul.f32 %v1723_v52, %v870_v49  ;;  %1316 = vmatpush.msrb.mxu3 %v1074_v62  ;;  %1257 = vmatpush.msrb.mxu0 %v1039_v13  ;;  %vm912_vm0 = vcmp.eq.f32.partialorder %v911_v32, 8.507059e+37  ;;  %v1035_v41 = vld [vmem:[#allocation6] sm:$0xff]  ;;  %v1036_v31 = vld [vmem:[#allocation6 + $0x8] sm:$0xff]  ;;  %v1724_v62 = vld [vmem:[%s2001_s12 + $0xf0] sm:$0xff] }
 0x1de   : > { %v1020_v40 = vmax.f32 %v1018_v61, %v2525_v9  ;;  %v1021_v53 = vmax.f32 %v1019_v11, %v2739_v48  ;;  %v957_v35 = vadd.f32 %v956_v24, %v2715_v6  ;;  %v1004_v0 = vmax.f32 %v1002_v16, %v2812_v5  ;;  %1277 = vmatpush.msrb.mxu1 %v1071_v3  ;;  %v1725_v13 = vld [vmem:[%s2001_s12 + $0xf8] sm:$0xff]  ;;  %s1324_s12 = sld [smem:[#allocation2]] }
 0x1df   : > { %v910_v17 = vsel %vm2854_vm15, %v2775_v26, %v906_v15  ;;  %v1003_v30 = vmax.f32 %v1001_v8, %v2847_v21  ;;  %1297 = vmatpush.msrb.mxu2 %v1040_v56  ;;  %1317 = vmatpush.msrb.mxu3 %v1072_v18  ;;  %v1067_v26 = vld [vmem:[#allocation6 + $0x100] sm:$0xff]  ;;  %v977_v16 = vadd.f32 %v2706_v12, %v2525_v9 }
 0x1e0   : > { %v915_v22 = vsel %vm912_vm0, %v914_v7, %v910_v17  ;;  %v1022_v14 = vmax.f32 %v1020_v40, %v2773_v44  ;;  %v1023_v32 = vmax.f32 %v1021_v53, %v2792_v63  ;;  %1258 = vmatpush.msrb.mxu0 %v1037_v33  ;;  %1278 = vmatpush.msrb.mxu1 %v1069_v42 }
 0x1e1   : > { %v2872_v8 = vmul.f32 %v1724_v62, %v915_v22  ;;  %v2875_v24 = vmul.f32 %v1725_v13, %v915_v22  ;;  %1298 = vmatpush.msrb.mxu2 %v1038_v47  ;;  %1318 = vmatpush.msrb.mxu3 %v1070_v10  ;;  %v958_v11 = vadd.f32 %v957_v35, %v2750_v38 }
 0x1e2   : > { %v1024_v49 = vmax.f32 %v1022_v14, %v2850_v20  ;;  %v1025_v61 = vmax.f32 %v1023_v32, %v2826_v29  ;;  %1259 = vmatpush.msrb.mxu0 %v1035_v41  ;;  %v1005_v3 = vmax.f32 %v1003_v30, %v2770_v54  ;;  %1279 = vmatpush.msrb.mxu1 %v1067_v26 }
 0x1e3   : > { %v1006_v56 = vmax.f32 %v1004_v0, %v2872_v8  ;;  %1299 = vmatpush.msrb.mxu2 %v1036_v31  ;;  %v978_v15 = vadd.f32 %v977_v16, %v2739_v48  ;;  %1319 = vmatpush.msrb.mxu3 %v1068_v55  ;;  %v959_v52 = vadd.f32 %v958_v11, %v2758_v60 }
 0x1e4   : > { %v1026_v45 = vmax.f32 %v1024_v49, %v2806_v23  ;;  %v1027_v12 = vmax.f32 %v1025_v61, %v2875_v24 }
 0x1e5   : > { %v1007_v18 = vmax.f32 %v1005_v3, %v1006_v56  ;;  %v979_v33 = vadd.f32 %v978_v15, %v2773_v44  ;;  %v960_v7 = vadd.f32 %v959_v52, %v2847_v21 }
 0x1e6   : > { %v1028_v1 = vmax.f32 %v1026_v45, %v1027_v12 }
 0x1e7   : > { %v1008_v40 = vrot.slane %v1007_v18, 4  ;;  %v980_v53 = vadd.f32 %v979_v33, %v2792_v63  ;;  %v961_v47 = vadd.f32 %v960_v7, %v2812_v5 }
 0x1e8   : > { %v1029_v42 = vrot.slane %v1028_v1, 4 }
 0x1e9   : > { %v1009_v35 = vmax.f32 %v1007_v18, %v1008_v40  ;;  %v981_v17 = vadd.f32 %v980_v53, %v2850_v20  ;;  %v962_v0 = vadd.f32 %v961_v47, %v2770_v54 }
 0x1ea   : > { %v1030_v30 = vmax.f32 %v1028_v1, %v1029_v42 }
 0x1eb   : > { %v1010_v10 = vrot.slane %v1009_v35, 2  ;;  %v982_v41 = vadd.f32 %v981_v17, %v2826_v29  ;;  %v963_v14 = vadd.f32 %v962_v0, %v2872_v8 }
 0x1ec   : > { %v1031_v22 = vrot.slane %v1030_v30, 2 }
 0x1ed   : > { %v1011_v32 = vmax.f32 %v1009_v35, %v1010_v10  ;;  %v983_v26 = vadd.f32 %v982_v41, %v2806_v23  ;;  %v964_v62 = vrot.slane %v963_v14, 4 }
 0x1ee   : > { %v1032_v31 = vmax.f32 %v1030_v30, %v1031_v22  ;;  %v1325_v22 = vstv %s1324_s12 }
 0x1ef   : > { %v1012_v13 = vrot.slane %v1011_v32, 1  ;;  %v984_v55 = vadd.f32 %v983_v26, %v2875_v24  ;;  %v965_v49 = vadd.f32 %v964_v62, %v963_v14 }
 0x1f0   : > { %v1033_v16 = vrot.slane %v1032_v31, 1 }
 0x1f1   : > { %v1013_v61 = vmax.f32 %v1011_v32, %v1012_v13  ;;  %v985_v11 = vrot.slane %v984_v55, 4  ;;  %v966_v56 = vrot.slane %v965_v49, 2 }
 0x1f2   : > { %v1034_v3 = vmax.f32 %v1032_v31, %v1033_v16 }
 0x1f3   : > { %1180 = vmatmul.f32.vlgmr.msra.gmra.mxu0 %v1013_v61  ;;  %1220 = vmatmul.f32.vlgmr.msra.gmra.mxu2 %v1013_v61  ;;  %v986_v15 = vadd.f32 %v985_v11, %v984_v55  ;;  %v967_v45 = vadd.f32 %v966_v56, %v965_v49 }
 0x1f4   : > { %1200 = vmatmul.f32.vlgmr.msra.gmra.mxu1 %v1034_v3  ;;  %1240 = vmatmul.f32.vlgmr.msra.gmra.mxu3 %v1034_v3 }
 0x1f5   : > { %v987_v12 = vrot.slane %v986_v15, 2  ;;  %v968_v52 = vrot.slane %v967_v45, 1 }
 0x1f7   : > { %v988_v18 = vadd.f32 %v987_v12, %v986_v15  ;;  %v969_v33 = vadd.f32 %v968_v52, %v967_v45 }
 0x1f9   : > { %v989_v1 = vrot.slane %v988_v18, 1  ;;  %v991_v7 = vmul.f32 0.0078125, %v969_v33 }
 0x1fb   : > { %v990_v40 = vadd.f32 %v989_v1, %v988_v18  ;;  %1260 = vmatmul.f32.vlgmr.msrb.gmra.mxu0 %v991_v7  ;;  %1300 = vmatmul.f32.vlgmr.msrb.gmra.mxu2 %v991_v7 }
 0x1fd   : > { %v992_v53 = vmul.f32 0.0078125, %v990_v40 }
 0x1ff   : > { %1280 = vmatmul.f32.vlgmr.msrb.gmra.mxu1 %v992_v53  ;;  %1320 = vmatmul.f32.vlgmr.msrb.gmra.mxu3 %v992_v53 }
 0x270   : > { %v1181_v42 = vpop.f32.mrf.mxu0 }
 0x271   : > { %v1201_v47 = vpop.f32.mrf.mxu1 }
 0x272   : > { %v1202_v17 = vadd.f32 %v1201_v47, %v1181_v42 }
 0x276   : > { %v1221_v35 = vpop.f32.mrf.mxu2 }
 0x277   : > { %v1241_v30 = vpop.f32.mrf.mxu3 }
 0x278   : > { %v1261_v0 = vpop.f32.mrf.mxu0  ;;  %v1242_v32 = vadd.f32 %v1241_v30, %v1221_v35 }
 0x279   : > { %v1262_v10 = vadd.f32 %v1261_v0, %v1202_v17 }
 0x27c   : > { %v1281_v41 = vpop.f32.mrf.mxu1 }
 0x27d   : > { %v1282_v14 = vadd.f32 %v1281_v41, %v1262_v10 }
 0x27e   : > { %v1301_v31 = vpop.f32.mrf.mxu2 }
 0x27f   : > { %v1326_v26 = vadd.f32 %v1325_v22, %v1282_v14  ;;  %v1302_v62 = vadd.f32 %v1301_v31, %v1242_v32 }
 0x281   : > { %v1558_v13 = vmul.f32 -1.442695, %v1326_v26 }
 0x282   : > { %v1321_v55 = vpop.f32.mrf.mxu3 }
 0x283   : > { %1692 = vpow2.f32 %v1558_v13  ;;  %v1322_v16 = vadd.f32 %v1321_v55, %v1302_v62 }
 0x285   : > { %v1327_v49 = vadd.f32 %v1325_v22, %v1322_v16 }
 0x287   : > { %v1559_v61 = vmul.f32 -1.442695, %v1327_v49 }
 0x289   : > { %v1693_v11 = vpop.eup %1692  ;;  %1694 = vpow2.f32 %v1559_v61 }
 0x28a   : > { %v1334_v3 = vadd.f32 1.0, %v1693_v11 }
 0x28c   : > { %1696 = vrcp.f32 %v1334_v3  ;;  %v1347_v18 = vand.u32 2147483648, %v1334_v3  ;;  %v1345_v1 = vand.u32 2147483647, %v1334_v3  ;;  %vm1341_vm2 = vweird.f32 %v1334_v3 }
 0x28e   : > { %v1348_v42 = vor.u32 1.1754944e-38, %v1347_v18  ;;  %vm1346_vm4 = vcmp.eq.f32.partialorder %v1345_v1, 8.507059e+37 }
 0x28f   : > { %v1695_v56 = vpop.eup %1694 }
 0x290   : > { %v1335_v15 = vadd.f32 1.0, %v1695_v56 }
 0x292   : > { %v1697_v45 = vpop.eup %1696  ;;  %1698 = vrcp.f32 %v1335_v15  ;;  %v1362_v32 = vand.u32 2147483648, %v1335_v15  ;;  %vm1356_vm6 = vweird.f32 %v1335_v15 }
 0x293   : > { %v1337_v12 = vmul.f32 %v1697_v45, %v1334_v3  ;;  %vm1342_vm1 = vweird.f32 %v1697_v45 }
 0x294   : > { %vm1343_vm3 = vmor %vm1341_vm2, %vm1342_vm1  ;;  %v1363_v31 = vor.u32 1.1754944e-38, %v1362_v32 }
 0x295   : > { %v1338_v52 = vsub.f32 1.0, %v1337_v12 }
 0x297   : > { %v1339_v33 = vmul.f32 %v1697_v45, %v1338_v52 }
 0x298   : > { %v1699_v7 = vpop.eup %1698 }
 0x299   : > { %v1340_v40 = vadd.f32 %v1697_v45, %v1339_v33  ;;  %v1352_v53 = vmul.f32 %v1699_v7, %v1335_v15  ;;  %vm1357_vm5 = vweird.f32 %v1699_v7 }
 0x29a   : > { %vm1358_vm7 = vmor %vm1356_vm6, %vm1357_vm5 }
 0x29b   : > { %v1344_v47 = vsel %vm1343_vm3, %v1697_v45, %v1340_v40  ;;  %v1353_v35 = vsub.f32 1.0, %v1352_v53 }
 0x29c   : > { %v1349_v17 = vsel %vm1346_vm4, %v1348_v42, %v1344_v47 }
 0x29d   : > { %v1366_v30 = vperm.slane %v1349_v17, 0  ;;  %v1354_v22 = vmul.f32 %v1699_v7, %v1353_v35 }
 0x29f   : > { %v1368_v0 = vmul.f32 %v1366_v30, %v2320_v28  ;;  %v1370_v10 = vmul.f32 %v1366_v30, %v2317_v27  ;;  %v1372_v41 = vmul.f32 %v1366_v30, %v2375_v58  ;;  %v1374_v14 = vmul.f32 %v1366_v30, %v2425_v2 }
 0x2a0   : > { %v1376_v26 = vmul.f32 %v1366_v30, %v2450_v59  ;;  %v1360_v28 = vand.u32 2147483647, %v1335_v15  ;;  %v1378_v27 = vmul.f32 %v1366_v30, %v2437_v34  ;;  %v1380_v58 = vmul.f32 %v1366_v30, %v2621_v43 }
 0x2a1   : > { %1400 = vst [vmem:[%s2905_s16] sm:$0xff] %v1368_v0  ;;  %v1355_v2 = vadd.f32 %v1699_v7, %v1354_v22  ;;  %v1382_v59 = vmul.f32 %v1366_v30, %v2555_v25  ;;  %v1384_v62 = vmul.f32 %v1366_v30, %v2508_v50  ;;  %v1386_v43 = vmul.f32 %v1366_v30, %v2715_v6 }
 0x2a2   : > { %1402 = vst [vmem:[%s2905_s16 + $0x10] sm:$0xff] %v1370_v10  ;;  %vm1361_vm8 = vcmp.eq.f32.partialorder %v1360_v28, 8.507059e+37  ;;  %v1388_v25 = vmul.f32 %v1366_v30, %v2750_v38  ;;  %v1390_v55 = vmul.f32 %v1366_v30, %v2758_v60  ;;  %v1392_v50 = vmul.f32 %v1366_v30, %v2847_v21 }
 0x2a3   : > { %1404 = vst [vmem:[%s2905_s16 + $0x20] sm:$0xff] %v1372_v41  ;;  %v1359_v34 = vsel %vm1358_vm7, %v1699_v7, %v1355_v2  ;;  %v1394_v49 = vmul.f32 %v1366_v30, %v2812_v5  ;;  %v1396_v6 = vmul.f32 %v1366_v30, %v2770_v54  ;;  %v1398_v38 = vmul.f32 %v1366_v30, %v2872_v8 }
 0x2a4   : > { %1406 = vst [vmem:[%s2905_s16 + $0x30] sm:$0xff] %v1374_v14  ;;  %v1364_v13 = vsel %vm1361_vm8, %v1363_v31, %v1359_v34 }
 0x2a5   : > { %1408 = vst [vmem:[%s2905_s16 + $0x40] sm:$0xff] %v1376_v26  ;;  %v1367_v16 = vperm.slane %v1364_v13, 0 }
 0x2a6   : > { %1410 = vst [vmem:[%s2905_s16 + $0x50] sm:$0xff] %v1378_v27 }
 0x2a7   : > { %1412 = vst [vmem:[%s2905_s16 + $0x60] sm:$0xff] %v1380_v58  ;;  %v1369_v60 = vmul.f32 %v1367_v16, %v2328_v37  ;;  %v1371_v21 = vmul.f32 %v1367_v16, %v2325_v36  ;;  %v1373_v5 = vmul.f32 %v1367_v16, %v2378_v46  ;;  %v1375_v54 = vmul.f32 %v1367_v16, %v2428_v39 }
 0x2a8   : > { %1414 = vst [vmem:[%s2905_s16 + $0x70] sm:$0xff] %v1382_v59  ;;  %v1377_v8 = vmul.f32 %v1367_v16, %v2462_v57  ;;  %v1379_v61 = vmul.f32 %v1367_v16, %v2488_v4  ;;  %v1381_v37 = vmul.f32 %v1367_v16, %v2624_v51  ;;  %v1383_v36 = vmul.f32 %v1367_v16, %v2563_v19 }
 0x2a9   : > { %1416 = vst [vmem:[%s2905_s16 + $0x80] sm:$0xff] %v1384_v62  ;;  %v1385_v46 = vmul.f32 %v1367_v16, %v2525_v9  ;;  %v1387_v39 = vmul.f32 %v1367_v16, %v2739_v48  ;;  %v1389_v57 = vmul.f32 %v1367_v16, %v2773_v44  ;;  %v1391_v4 = vmul.f32 %v1367_v16, %v2792_v63 }
 0x2aa   : > { %1418 = vst [vmem:[%s2905_s16 + $0x90] sm:$0xff] %v1386_v43  ;;  %v1393_v9 = vmul.f32 %v1367_v16, %v2850_v20  ;;  %v1395_v19 = vmul.f32 %v1367_v16, %v2826_v29  ;;  %v1397_v51 = vmul.f32 %v1367_v16, %v2806_v23  ;;  %v1399_v48 = vmul.f32 %v1367_v16, %v2875_v24 }
 0x2ab   : > { %1420 = vst [vmem:[%s2905_s16 + $0xa0] sm:$0xff] %v1388_v25 }
 0x2ac   : > { %1422 = vst [vmem:[%s2905_s16 + $0xb0] sm:$0xff] %v1390_v55 }
 0x2ad   : > { %1424 = vst [vmem:[%s2905_s16 + $0xc0] sm:$0xff] %v1392_v50 }
 0x2ae   : > { %1426 = vst [vmem:[%s2905_s16 + $0xd0] sm:$0xff] %v1394_v49 }
 0x2af   : > { %1428 = vst [vmem:[%s2905_s16 + $0xe0] sm:$0xff] %v1396_v6 }
 0x2b0   : > { %1430 = vst [vmem:[%s2905_s16 + $0xf0] sm:$0xff] %v1398_v38 }
 0x2b1   : > { %1401 = vst [vmem:[%s2905_s16 + $0x8] sm:$0xff] %v1369_v60 }
 0x2b2   : > { %1403 = vst [vmem:[%s2905_s16 + $0x18] sm:$0xff] %v1371_v21 }
 0x2b3   : > { %1405 = vst [vmem:[%s2905_s16 + $0x28] sm:$0xff] %v1373_v5 }
 0x2b4   : > { %1407 = vst [vmem:[%s2905_s16 + $0x38] sm:$0xff] %v1375_v54 }
 0x2b5   : > { %1409 = vst [vmem:[%s2905_s16 + $0x48] sm:$0xff] %v1377_v8 }
 0x2b6   : > { %1411 = vst [vmem:[%s2905_s16 + $0x58] sm:$0xff] %v1379_v61 }
 0x2b7   : > { %1413 = vst [vmem:[%s2905_s16 + $0x68] sm:$0xff] %v1381_v37 }
 0x2b8   : > { %1415 = vst [vmem:[%s2905_s16 + $0x78] sm:$0xff] %v1383_v36 }
 0x2b9   : > { %1417 = vst [vmem:[%s2905_s16 + $0x88] sm:$0xff] %v1385_v46 }
 0x2ba   : > { %1419 = vst [vmem:[%s2905_s16 + $0x98] sm:$0xff] %v1387_v39 }
 0x2bb   : > { %1421 = vst [vmem:[%s2905_s16 + $0xa8] sm:$0xff] %v1389_v57 }
 0x2bc   : > { %1423 = vst [vmem:[%s2905_s16 + $0xb8] sm:$0xff] %v1391_v4 }
 0x2bd   : > { %1425 = vst [vmem:[%s2905_s16 + $0xc8] sm:$0xff] %v1393_v9 }
 0x2be   : > { %1427 = vst [vmem:[%s2905_s16 + $0xd8] sm:$0xff] %v1395_v19 }
 0x2bf   : > { %1429 = vst [vmem:[%s2905_s16 + $0xe8] sm:$0xff] %v1397_v51 }
 0x2c0   : > { %1431 = vst [vmem:[%s2905_s16 + $0xf8] sm:$0xff] %v1399_v48 }
 0x2c1   : > { %1813 = shalt.err (!%p1810_p10)
}
 0x2c2   : > { %s1861_s15 = smov 256   ;;  %s1862_s7 = smov 16  }
 0x2c3   : > { %1573 = dma.vmem_to_hbm [thread:$0]  (%p1965_p3), %s1446_s4, 4096, %s1448_s24, %s1433_s11, %s1861_s15, %s1861_s15, %s1862_s7  }
 0x2c4 PF: > { %s1462_s12 = sand.u32 1, %s1844_s20   ;;  %p3071_p12 = scmp.ge.s32.totalorder %s1856_s23, 2 }
 0x2c5   : > { %s1463_s16 = scalar_lea.sflag [#allocation5], %s1462_s12 }
 0x2c6   : > { %p1584_p13 = pnand %p3071_p12, %p1931_p6 }
 0x2c8   : > { %p1585_p0 = pneg %p1584_p13 }
 0x2ca   : > { %1839 = dma.done.wait (%p1585_p0), %s1463_s16, 4096  }
 0x2cb   : > { %1841 = vsyncadd (%p1585_p0), %s1463_s16, 4294963200  ;;  %p20_p5 = scmp.ge.s32.totalorder %s1949_s8, 4   ;;  %s3072_s20 = smov %s1848_s21 }
 0x2cc   : > { %s3073_s21 = smov %s1852_s22  ;;  %s3074_s22 = smov %s1961_s13 }
 0x2cd   : > { %s3075_s23 = smov %s1949_s8  ;;  %22 = sbr.rel (!%p20_p5) target bundleno = 8 (0x8), region = 90 }
 0x2d2   :  { %1469 = vsyncpa [#allocation4], 1 }
 0x2d3   :  { %1471 = vsyncpa [#allocation4 + $0x1], 1 }
 0x2d4   :  { %1472 = vsyncpa [#allocation7], 1 }
 0x2d5   :  { %1473 = vsyncpa [#allocation5], 1 }
 0x2d6   :  { %1475 = vsyncpa [#allocation5 + $0x1], 1 }

</bundles_post_ra>
